<compile_context>
chip_gen: v6e
topology: v6e:2x2x1
jax: 0.10.0
libtpu: 0.0.40
codegen_flags: <defaults>
</compile_context>

<pallas_src>
import functools

import jax
import jax.numpy as jnp
import numpy as np
from jax import lax
from jax.experimental import pallas as pl
from jax.experimental.pallas import tpu as pltpu

jax.config.update("jax_default_matmul_precision", "highest")

DTYPE = jnp.float32  # TODO(synk): reference module is float64; TPU kernel uses float32.


# ----------------------------------------------------------------------------
# Deterministic parameter init (mimics torch.nn.Linear default U(-1/sqrt(fan_in), .))
# ----------------------------------------------------------------------------
def _uniform(key, shape, fan_in):
    bound = 1.0 / np.sqrt(fan_in)
    return jax.random.uniform(key, shape, dtype=DTYPE, minval=-bound, maxval=bound)


def init_params(p, key):
    ks = jax.random.split(key, 12)
    return dict(
        # col_learner: Linear(p-1,p) ReLU Linear(p,p) ReLU Linear(p,p-1)
        L1_w=_uniform(ks[0], (p, p - 1), p - 1), L1_b=_uniform(ks[1], (p,), p - 1),
        L2_w=_uniform(ks[2], (p, p), p),         L2_b=_uniform(ks[3], (p,), p),
        L3_w=_uniform(ks[4], (p - 1, p), p),     L3_b=_uniform(ks[5], (p - 1,), p),
        # alpha_learner: Linear(1,3) ReLU Linear(3,3) ReLU Linear(3,1) Exp
        A1_w=_uniform(ks[6], (3, 1), 1),  A1_b=_uniform(ks[7], (3,), 1),
        A2_w=_uniform(ks[8], (3, 3), 3),  A2_b=_uniform(ks[9], (3,), 3),
        A3_w=_uniform(ks[10], (1, 3), 3), A3_b=_uniform(ks[11], (1,), 3),
    )


def lift_col_weights(params, p):
    """Embed the (p-1)-dim col_learner in/out dims into p-sized slots, per column.

    Slot `col` of the lifted weights is zeroed so the kernel never gathers; these
    live in HBM and are streamed one (p,p) slab per column by the grid.
    """
    L1_w, L3_w, L3_b = params["L1_w"], params["L3_w"], params["L3_b"]
    W1L, W3L, B3L = [], [], []
    for col in range(p):
        rows = np.array([i for i in range(p) if i != col])
        m1 = jnp.zeros((p, p), DTYPE).at[rows, :].set(L1_w.T)   # (in_full=p, out=p)
        m3 = jnp.zeros((p, p), DTYPE).at[:, rows].set(L3_w.T)   # (in=p, out_full=p)
        b3 = jnp.zeros((p,), DTYPE).at[rows].set(L3_b)
        W1L.append(m1); W3L.append(m3); B3L.append(b3.reshape(1, p))
    return jnp.stack(W1L), jnp.stack(W3L), jnp.stack(B3L)       # (p,p,p),(p,p,p),(p,1,p)


# ----------------------------------------------------------------------------
# Pallas kernel: one column update per grid step; W/Theta persist in VMEM scratch
# ----------------------------------------------------------------------------
def spodnet_kernel(K, p,
                   w0_ref, th0_ref,
                   w1l_ref, b1_ref, w2t_ref, b2_ref, w3l_ref, b3l_ref,
                   a1w_ref, a1b_ref, a2t_ref, a2b_ref, a3w_ref, a3b_ref,
                   out_ref, w_scr, t_scr):
    k = pl.program_id(1)     # sweep index
    col = pl.program_id(2)   # column index

    # Initialize the persistent scratch at the start of every batch block.
    @pl.when((k == 0) & (col == 0))
    def _init():
        w_scr[...] = w0_ref[...]
        t_scr[...] = th0_ref[...]

    lane = lax.broadcasted_iota(jnp.int32, (1, p), 1)
    e = (lane == col).astype(DTYPE)                                   # (1,p) one-hot
    ne = 1.0 - e
    lane_e3 = lax.broadcasted_iota(jnp.int32, (1, 1, p), 2) == col    # (1,1,p) bool

    # --- cheap row read on the leading axis (row col == column col by symmetry)
    w_row = w_scr[col]                                                # (bb, p)
    t_row = t_scr[col]                                                # (bb, p)
    w22 = jnp.sum(w_row * e, axis=-1, keepdims=True)                  # (bb, 1)
    th22 = jnp.sum(t_row * e, axis=-1, keepdims=True)                 # (bb, 1)
    w12 = w_row * ne                                                  # zero at `col`
    th12 = t_row * ne                                                 # zero at `col`
    rth22 = pl.reciprocal(th22, approx=False)                         # (bb, 1)

    # --- col_learner MLP (per-column lifted weights streamed from HBM)
    h1 = jnp.maximum(
        jnp.dot(w12, w1l_ref[...], preferred_element_type=jnp.float32) + b1_ref[...], 0.0)
    h2 = jnp.maximum(
        jnp.dot(h1, w2t_ref[...], preferred_element_type=jnp.float32) + b2_ref[...], 0.0)
    w12n = jnp.dot(h2, w3l_ref[...], preferred_element_type=jnp.float32) + b3l_ref[...]
    # w12n is (bb, p), exactly zero at slot `col`.

    # --- alpha_learner MLP on the diagonal element (ends with Exp)
    a1 = jnp.maximum(w22 * a1w_ref[...] + a1b_ref[...], 0.0)                      # (bb,3)
    a2 = jnp.maximum(jnp.sum(a1[:, :, None] * a2t_ref[...][None, :, :], axis=1)
                     + a2b_ref[...], 0.0)                                         # (bb,3)
    alpha = jnp.exp(jnp.sum(a2 * a3w_ref[...], axis=-1, keepdims=True) + a3b_ref[...])

    # --- Schur complement path without materializing inv(W_11):
    #     tvec = invW11 @ w12n = Theta @ w12n - th12 * (th12 . w12n) / th22
    T = t_scr[...]                                                    # (p, bb, p)
    Tw = jnp.sum(T * w12n[None, :, :], axis=-1)                       # (p, bb)
    dotp = jnp.sum(th12 * w12n, axis=-1, keepdims=True)               # (bb, 1)
    tvec = Tw.T - th12 * (rth22 * dotp)                               # (bb, p) (slot col unused)
    zeta = jnp.sum(tvec * w12n, axis=-1, keepdims=True)               # (bb, 1)
    w22n = alpha + zeta
    denom = w22n - zeta                                               # == 1 / theta_22_next
    th22n = pl.reciprocal(denom, approx=False)
    th12n = -(th22n * tvec) * ne                                      # (bb, p), zero at col

    neww = w12n + w22n * e                                            # new W row/col incl diag
    newt = th12n + th22n * e                                          # new Theta row/col incl diag

    # --- W update: only column `col` (lane-masked select) and row `col` (dynamic store)
    w_scr[...] = jnp.where(lane_e3, neww.T[:, :, None], w_scr[...])
    w_scr[pl.ds(col, 1)] = neww[None, :, :]

    # --- Theta update: in-place rank-2 update of the off-block, then row/col/diag
    rank2 = (T
             - (th12.T * rth22.T)[:, :, None] * th12[None, :, :]
             + (th12n.T * denom.T)[:, :, None] * th12n[None, :, :])
    t_scr[...] = jnp.where(lane_e3, newt.T[:, :, None], rank2)
    t_scr[pl.ds(col, 1)] = newt[None, :, :]

    # Write the output once per batch block, at the last (k, col) step.
    @pl.when((k == K - 1) & (col == p - 1))
    def _writeback():
        out_ref[...] = w_scr[...]


@functools.partial(jax.jit, static_argnames=("K", "bb"))
def spodnet_forward(S, params, diag_init, *, K, bb=None):
    B, p, _ = S.shape
    bb = B if bb is None else bb
    assert B % bb == 0, "batch must be divisible by the batch block"
    nb = B // bb

    W0 = S + diag_init * jnp.eye(p, dtype=S.dtype)
    # TODO(synk): torch.linalg.pinv(hermitian=True) has no Pallas equivalent; plain JAX.
    Theta0 = jnp.linalg.pinv(W0, hermitian=True)

    # Kernel layout (batch_block, row, batch_in_block, col) so per-column row
    # access is a dynamic slice on a leading, untiled axis.
    def to_kernel_layout(X):
        return X.reshape(nb, bb, p, p).transpose(0, 2, 1, 3)

    W0_t = to_kernel_layout(W0)
    Th0_t = to_kernel_layout(Theta0)
    W1L, W3L, B3L = lift_col_weights(params, p)   # stay in HBM, streamed per column

    batch_blk = lambda b, k, c: (b, 0, 0, 0)
    col_blk = lambda b, k, c: (c, 0, 0)
    const2 = lambda b, k, c: (0, 0)

    # VMEM budget: W/Theta scratch + double-buffered batch blocks + streamed weight slabs.
    blk = bb * p * p * 4
    wgt = p * p * 4
    est = 2 * blk + 3 * 2 * blk + 5 * 2 * wgt + (1 << 20)
    vmem_limit = int(min(64 << 20, max(8 << 20, est)))

    kernel = functools.partial(spodnet_kernel, K, p)
    out_t = pl.pallas_call(
        kernel,
        out_shape=jax.ShapeDtypeStruct((nb, p, bb, p), S.dtype),
        grid_spec=pltpu.PrefetchScalarGridSpec(
            num_scalar_prefetch=0,
            grid=(nb, K, p),
            in_specs=[
                pl.BlockSpec((None, p, bb, p), batch_blk),   # W0
                pl.BlockSpec((None, p, bb, p), batch_blk),   # Theta0
                pl.BlockSpec((None, p, p), col_blk),         # lifted L1 weights (per col)
                pl.BlockSpec((1, p), const2),                # L1 bias
                pl.BlockSpec((p, p), const2),                # L2 weight (transposed)
                pl.BlockSpec((1, p), const2),                # L2 bias
                pl.BlockSpec((None, p, p), col_blk),         # lifted L3 weights (per col)
                pl.BlockSpec((None, 1, p), col_blk),         # lifted L3 bias (per col)
                pl.BlockSpec((1, 3), const2),                # A1 weight^T
                pl.BlockSpec((1, 3), const2),                # A1 bias
                pl.BlockSpec((3, 3), const2),                # A2 weight^T
                pl.BlockSpec((1, 3), const2),                # A2 bias
                pl.BlockSpec((1, 3), const2),                # A3 weight^T
                pl.BlockSpec((1, 1), const2),                # A3 bias
            ],
            out_specs=pl.BlockSpec((None, p, bb, p), batch_blk),
            scratch_shapes=[pltpu.VMEM((p, bb, p), jnp.float32),
                            pltpu.VMEM((p, bb, p), jnp.float32)],
        ),
        compiler_params=pltpu.CompilerParams(
            dimension_semantics=("parallel", "arbitrary", "arbitrary"),
            vmem_limit_bytes=vmem_limit),
        input_output_aliases={0: 0},
    )(W0_t, Th0_t,
      W1L, params["L1_b"].reshape(1, p),
      params["L2_w"].T, params["L2_b"].reshape(1, p),
      W3L, B3L,
      params["A1_w"].reshape(1, 3), params["A1_b"].reshape(1, 3),
      params["A2_w"].T, params["A2_b"].reshape(1, 3),
      params["A3_w"].reshape(1, 3), params["A3_b"].reshape(1, 1))

    return out_t.transpose(0, 2, 1, 3).reshape(B, p, p)


# ----------------------------------------------------------------------------
# Pure-JAX reference (mirrors the PyTorch code literally) for validation
# ----------------------------------------------------------------------------
def spodnet_reference(S, params, K, diag_init=0.1):
    B, p, _ = S.shape
    W = S + diag_init * jnp.eye(p, dtype=S.dtype)
    Theta = jnp.linalg.pinv(W, hermitian=True)
    relu = lambda x: jnp.maximum(x, 0.0)
    for _ in range(K):
        for col in range(p):
            minus = np.array([i for i in range(p) if i != col])
            w22 = W[:, col, col]
            w12 = W[:, minus, col]
            Theta11 = Theta[:, minus[:, None], minus[None, :]]
            th22 = Theta[:, col, col]
            th12 = Theta[:, minus, col]
            h1 = relu(w12 @ params["L1_w"].T + params["L1_b"])
            h2 = relu(h1 @ params["L2_w"].T + params["L2_b"])
            w12n = h2 @ params["L3_w"].T + params["L3_b"]
            a1 = relu(w22[:, None] @ params["A1_w"].T + params["A1_b"])
            a2 = relu(a1 @ params["A2_w"].T + params["A2_b"])
            alpha = jnp.exp(a2 @ params["A3_w"].T + params["A3_b"])[:, 0]
            invW11 = Theta11 - th12[:, :, None] * th12[:, None, :] / th22[:, None, None]
            tvec = jnp.einsum("bij,bj->bi", invW11, w12n)
            zeta = jnp.sum(tvec * w12n, axis=-1)
            w22n = alpha + zeta
            W = W.at[:, col, col].set(w22n)
            W = W.at[:, minus, col].set(w12n)
            W = W.at[:, col, minus].set(w12n)
            th22n = 1.0 / (w22n - zeta)
            th12n = -th22n[:, None] * tvec
            Theta = Theta.at[:, minus[:, None], minus[None, :]].set(
                invW11 + th12n[:, :, None] * th12n[:, None, :] / th22n[:, None, None])
            Theta = Theta.at[:, minus, col].set(th12n)
            Theta = Theta.at[:, col, minus].set(th12n)
            Theta = Theta.at[:, col, col].set(th22n)
    return W


if __name__ == "__main__":
    B, p, K, bb = 4, 8, 2, 2
    key = jax.random.PRNGKey(0)
    k_s, k_p = jax.random.split(key)
    A = jax.random.normal(k_s, (B, p, p), dtype=DTYPE)
    S = jnp.einsum("bij,bkj->bik", A, A) / p          # symmetric PSD "covariance" input
    params = init_params(p, k_p)

    W = spodnet_forward(S, params, 0.1, K=K, bb=bb)
    W = jax.block_until_ready(W)

    W_ref = spodnet_reference(S, params, K, diag_init=0.1)
    np.testing.assert_allclose(np.asarray(W), np.asarray(W_ref), rtol=2e-3, atol=2e-3)
    assert np.all(np.isfinite(np.asarray(W)))
    print("KERNEL_OK")
</pallas_src>

<mosaic_0001>
module attributes {stable_mosaic.version = 11 : i64} {
  func.func @spodnet_kernel(%arg0: i32, %arg1: i32, %arg2: i32, %arg3: memref<1x8x2x8xf32, #tpu.memory_space<vmem>>, %arg4: memref<1x8x2x8xf32, #tpu.memory_space<vmem>>, %arg5: memref<1x8x8xf32, #tpu.memory_space<vmem>>, %arg6: memref<1x8xf32, #tpu.memory_space<vmem>>, %arg7: memref<8x8xf32, #tpu.memory_space<vmem>>, %arg8: memref<1x8xf32, #tpu.memory_space<vmem>>, %arg9: memref<1x8x8xf32, #tpu.memory_space<vmem>>, %arg10: memref<1x1x8xf32, #tpu.memory_space<vmem>>, %arg11: memref<1x3xf32, #tpu.memory_space<vmem>>, %arg12: memref<1x3xf32, #tpu.memory_space<vmem>>, %arg13: memref<3x3xf32, #tpu.memory_space<vmem>>, %arg14: memref<1x3xf32, #tpu.memory_space<vmem>>, %arg15: memref<1x3xf32, #tpu.memory_space<vmem>>, %arg16: memref<1x1xf32, #tpu.memory_space<vmem>>, %arg17: memref<1x8x2x8xf32, #tpu.memory_space<vmem>>, %arg18: memref<8x2x8xf32, #tpu.memory_space<vmem>>, %arg19: memref<8x2x8xf32, #tpu.memory_space<vmem>>) attributes {dimension_semantics = [#tpu.dimension_semantics<parallel>, #tpu.dimension_semantics<arbitrary>, #tpu.dimension_semantics<arbitrary>], iteration_bounds = array<i64: 2, 2, 8>, scalar_prefetch = 0 : i64, scratch_operands = 2 : i64, tpu.core_type = #tpu.core_type<tc>, window_params = [{transform_indices = @transform_0, window_bounds = array<i64: 1, 8, 2, 8>}, {transform_indices = @transform_1, window_bounds = array<i64: 1, 8, 2, 8>}, {transform_indices = @transform_2, window_bounds = array<i64: 1, 8, 8>}, {pipeline_mode = #tpu.pipeline_mode<synchronous>, transform_indices = @transform_3, window_bounds = array<i64: 1, 8>}, {pipeline_mode = #tpu.pipeline_mode<synchronous>, transform_indices = @transform_4, window_bounds = array<i64: 8, 8>}, {pipeline_mode = #tpu.pipeline_mode<synchronous>, transform_indices = @transform_5, window_bounds = array<i64: 1, 8>}, {transform_indices = @transform_6, window_bounds = array<i64: 1, 8, 8>}, {transform_indices = @transform_7, window_bounds = array<i64: 1, 1, 8>}, {pipeline_mode = #tpu.pipeline_mode<synchronous>, transform_indices = @transform_8, window_bounds = array<i64: 1, 3>}, {pipeline_mode = #tpu.pipeline_mode<synchronous>, transform_indices = @transform_9, window_bounds = array<i64: 1, 3>}, {pipeline_mode = #tpu.pipeline_mode<synchronous>, transform_indices = @transform_10, window_bounds = array<i64: 3, 3>}, {pipeline_mode = #tpu.pipeline_mode<synchronous>, transform_indices = @transform_11, window_bounds = array<i64: 1, 3>}, {pipeline_mode = #tpu.pipeline_mode<synchronous>, transform_indices = @transform_12, window_bounds = array<i64: 1, 3>}, {pipeline_mode = #tpu.pipeline_mode<synchronous>, transform_indices = @transform_13, window_bounds = array<i64: 1, 1>}, {transform_indices = @transform_14, window_bounds = array<i64: 1, 8, 2, 8>}]} {
    %c0_i32 = arith.constant 0 : i32
    %0 = arith.cmpi eq, %arg1, %c0_i32 : i32
    %c0_i32_0 = arith.constant 0 : i32
    %1 = arith.cmpi eq, %arg2, %c0_i32_0 : i32
    %2 = arith.andi %0, %1 : i1
    %3 = arith.extui %2 : i1 to i32
    %c0_i32_1 = arith.constant 0 : i32
    %4 = arith.cmpi ne, %3, %c0_i32_1 : i32
    scf.if %4 {
      %c0_64 = arith.constant 0 : index
      %c0_65 = arith.constant 0 : index
      %c0_66 = arith.constant 0 : index
      %c0_67 = arith.constant 0 : index
      %167 = vector.load %arg3[%c0_64, %c0_65, %c0_66, %c0_67] : memref<1x8x2x8xf32, #tpu.memory_space<vmem>>, vector<1x8x2x8xf32>
      %168 = vector.shape_cast %167 : vector<1x8x2x8xf32> to vector<8x2x8xf32>
      %c0_68 = arith.constant 0 : index
      %c0_69 = arith.constant 0 : index
      %c0_70 = arith.constant 0 : index
      %169 = vector.load %arg18[%c0_68, %c0_69, %c0_70] : memref<8x2x8xf32, #tpu.memory_space<vmem>>, vector<8x2x8xf32>
      tpu.vector_store %arg18[%c0_68, %c0_69, %c0_70], %168 {strides = array<i32>} : memref<8x2x8xf32, #tpu.memory_space<vmem>>, vector<8x2x8xf32>,
      %c0_71 = arith.constant 0 : index
      %c0_72 = arith.constant 0 : index
      %c0_73 = arith.constant 0 : index
      %c0_74 = arith.constant 0 : index
      %170 = vector.load %arg4[%c0_71, %c0_72, %c0_73, %c0_74] : memref<1x8x2x8xf32, #tpu.memory_space<vmem>>, vector<1x8x2x8xf32>
      %171 = vector.shape_cast %170 : vector<1x8x2x8xf32> to vector<8x2x8xf32>
      %c0_75 = arith.constant 0 : index
      %c0_76 = arith.constant 0 : index
      %c0_77 = arith.constant 0 : index
      %172 = vector.load %arg19[%c0_75, %c0_76, %c0_77] : memref<8x2x8xf32, #tpu.memory_space<vmem>>, vector<8x2x8xf32>
      tpu.vector_store %arg19[%c0_75, %c0_76, %c0_77], %171 {strides = array<i32>} : memref<8x2x8xf32, #tpu.memory_space<vmem>>, vector<8x2x8xf32>,
    } else {
    }
    %5 = tpu.iota {dimensions = array<i32: 1>} : vector<1x8xi32>
    %6 = vector.broadcast %arg2 : i32 to vector<1x8xi32>
    %7 = arith.cmpi eq, %5, %6 : vector<1x8xi32>
    %8 = arith.extui %7 : vector<1x8xi1> to vector<1x8xi32>
    %9 = arith.sitofp %8 : vector<1x8xi32> to vector<1x8xf32>
    %cst = arith.constant 1.000000e+00 : f32
    %10 = vector.broadcast %cst : f32 to vector<1x8xf32>
    %11 = arith.subf %10, %9 : vector<1x8xf32>
    %12 = tpu.iota {dimensions = array<i32: 2>} : vector<1x1x8xi32>
    %13 = vector.broadcast %arg2 : i32 to vector<1x1x8xi32>
    %14 = arith.cmpi eq, %12, %13 : vector<1x1x8xi32>
    %15 = arith.index_cast %arg2 : i32 to index
    %c0 = arith.constant 0 : index
    %c0_2 = arith.constant 0 : index
    %16 = vector.load %arg18[%15, %c0, %c0_2] : memref<8x2x8xf32, #tpu.memory_space<vmem>>, vector<1x2x8xf32>
    %17 = vector.shape_cast %16 : vector<1x2x8xf32> to vector<2x8xf32>
    %18 = arith.index_cast %arg2 : i32 to index
    %c0_3 = arith.constant 0 : index
    %c0_4 = arith.constant 0 : index
    %19 = vector.load %arg19[%18, %c0_3, %c0_4] : memref<8x2x8xf32, #tpu.memory_space<vmem>>, vector<1x2x8xf32>
    %20 = vector.shape_cast %19 : vector<1x2x8xf32> to vector<2x8xf32>
    %21 = vector.broadcast %9 : vector<1x8xf32> to vector<2x8xf32>
    %22 = arith.mulf %17, %21 : vector<2x8xf32>
    %cst_5 = arith.constant dense<0.000000e+00> : vector<2xf32>
    %23 = vector.multi_reduction <add>, %22, %cst_5 [1] : vector<2x8xf32> to vector<2xf32>
    %24 = vector.shape_cast %23 : vector<2xf32> to vector<2x1xf32>
    %25 = vector.broadcast %9 : vector<1x8xf32> to vector<2x8xf32>
    %26 = arith.mulf %20, %25 : vector<2x8xf32>
    %cst_6 = arith.constant dense<0.000000e+00> : vector<2xf32>
    %27 = vector.multi_reduction <add>, %26, %cst_6 [1] : vector<2x8xf32> to vector<2xf32>
    %28 = vector.shape_cast %27 : vector<2xf32> to vector<2x1xf32>
    %29 = vector.broadcast %11 : vector<1x8xf32> to vector<2x8xf32>
    %30 = arith.mulf %17, %29 : vector<2x8xf32>
    %31 = vector.broadcast %11 : vector<1x8xf32> to vector<2x8xf32>
    %32 = arith.mulf %20, %31 : vector<2x8xf32>
    %33 = tpu.reciprocal %28 : vector<2x1xf32> -> vector<2x1xf32>
    %c0_7 = arith.constant 0 : index
    %c0_8 = arith.constant 0 : index
    %c0_9 = arith.constant 0 : index
    %34 = vector.load %arg5[%c0_7, %c0_8, %c0_9] : memref<1x8x8xf32, #tpu.memory_space<vmem>>, vector<1x8x8xf32>
    %35 = vector.shape_cast %34 : vector<1x8x8xf32> to vector<8x8xf32>
    %cst_10 = arith.constant dense<0.000000e+00> : vector<2x8xf32>
    %36 = tpu.matmul %30, %35, %cst_10 {dimension_numbers = #tpu.dot_dimension_numbers<[1], [0], [0], [1], [0, 0, 1, 1], [], []>, precision = #tpu.contract_precision<fp32>} : vector<2x8xf32>, vector<8x8xf32>, vector<2x8xf32> -> vector<2x8xf32>
    %c0_11 = arith.constant 0 : index
    %c0_12 = arith.constant 0 : index
    %37 = vector.load %arg6[%c0_11, %c0_12] : memref<1x8xf32, #tpu.memory_space<vmem>>, vector<1x8xf32>
    %38 = vector.broadcast %37 : vector<1x8xf32> to vector<2x8xf32>
    %39 = arith.addf %36, %38 : vector<2x8xf32>
    %cst_13 = arith.constant 0.000000e+00 : f32
    %40 = vector.broadcast %cst_13 : f32 to vector<2x8xf32>
    %41 = arith.maximumf %39, %40 : vector<2x8xf32>
    %c0_14 = arith.constant 0 : index
    %c0_15 = arith.constant 0 : index
    %42 = vector.load %arg7[%c0_14, %c0_15] : memref<8x8xf32, #tpu.memory_space<vmem>>, vector<8x8xf32>
    %cst_16 = arith.constant dense<0.000000e+00> : vector<2x8xf32>
    %43 = tpu.matmul %41, %42, %cst_16 {dimension_numbers = #tpu.dot_dimension_numbers<[1], [0], [0], [1], [0, 0, 1, 1], [], []>, precision = #tpu.contract_precision<fp32>} : vector<2x8xf32>, vector<8x8xf32>, vector<2x8xf32> -> vector<2x8xf32>
    %c0_17 = arith.constant 0 : index
    %c0_18 = arith.constant 0 : index
    %44 = vector.load %arg8[%c0_17, %c0_18] : memref<1x8xf32, #tpu.memory_space<vmem>>, vector<1x8xf32>
    %45 = vector.broadcast %44 : vector<1x8xf32> to vector<2x8xf32>
    %46 = arith.addf %43, %45 : vector<2x8xf32>
    %cst_19 = arith.constant 0.000000e+00 : f32
    %47 = vector.broadcast %cst_19 : f32 to vector<2x8xf32>
    %48 = arith.maximumf %46, %47 : vector<2x8xf32>
    %c0_20 = arith.constant 0 : index
    %c0_21 = arith.constant 0 : index
    %c0_22 = arith.constant 0 : index
    %49 = vector.load %arg9[%c0_20, %c0_21, %c0_22] : memref<1x8x8xf32, #tpu.memory_space<vmem>>, vector<1x8x8xf32>
    %50 = vector.shape_cast %49 : vector<1x8x8xf32> to vector<8x8xf32>
    %cst_23 = arith.constant dense<0.000000e+00> : vector<2x8xf32>
    %51 = tpu.matmul %48, %50, %cst_23 {dimension_numbers = #tpu.dot_dimension_numbers<[1], [0], [0], [1], [0, 0, 1, 1], [], []>, precision = #tpu.contract_precision<fp32>} : vector<2x8xf32>, vector<8x8xf32>, vector<2x8xf32> -> vector<2x8xf32>
    %c0_24 = arith.constant 0 : index
    %c0_25 = arith.constant 0 : index
    %c0_26 = arith.constant 0 : index
    %52 = vector.load %arg10[%c0_24, %c0_25, %c0_26] : memref<1x1x8xf32, #tpu.memory_space<vmem>>, vector<1x1x8xf32>
    %53 = vector.shape_cast %52 : vector<1x1x8xf32> to vector<1x8xf32>
    %54 = vector.broadcast %53 : vector<1x8xf32> to vector<2x8xf32>
    %55 = arith.addf %51, %54 : vector<2x8xf32>
    %c0_27 = arith.constant 0 : index
    %c0_28 = arith.constant 0 : index
    %56 = vector.load %arg11[%c0_27, %c0_28] : memref<1x3xf32, #tpu.memory_space<vmem>>, vector<1x3xf32>
    %57 = vector.broadcast %24 : vector<2x1xf32> to vector<2x3xf32>
    %58 = vector.broadcast %56 : vector<1x3xf32> to vector<2x3xf32>
    %59 = arith.mulf %57, %58 : vector<2x3xf32>
    %c0_29 = arith.constant 0 : index
    %c0_30 = arith.constant 0 : index
    %60 = vector.load %arg12[%c0_29, %c0_30] : memref<1x3xf32, #tpu.memory_space<vmem>>, vector<1x3xf32>
    %61 = vector.broadcast %60 : vector<1x3xf32> to vector<2x3xf32>
    %62 = arith.addf %59, %61 : vector<2x3xf32>
    %cst_31 = arith.constant 0.000000e+00 : f32
    %63 = vector.broadcast %cst_31 : f32 to vector<2x3xf32>
    %64 = arith.maximumf %62, %63 : vector<2x3xf32>
    %65 = vector.shape_cast %64 : vector<2x3xf32> to vector<2x3x1xf32>
    %c0_32 = arith.constant 0 : index
    %c0_33 = arith.constant 0 : index
    %66 = vector.load %arg13[%c0_32, %c0_33] : memref<3x3xf32, #tpu.memory_space<vmem>>, vector<3x3xf32>
    %67 = vector.shape_cast %66 : vector<3x3xf32> to vector<1x3x3xf32>
    %68 = vector.broadcast %65 : vector<2x3x1xf32> to vector<2x3x3xf32>
    %69 = vector.broadcast %67 : vector<1x3x3xf32> to vector<2x3x3xf32>
    %70 = arith.mulf %68, %69 : vector<2x3x3xf32>
    %cst_34 = arith.constant dense<0.000000e+00> : vector<2x3xf32>
    %71 = vector.multi_reduction <add>, %70, %cst_34 [1] : vector<2x3x3xf32> to vector<2x3xf32>
    %c0_35 = arith.constant 0 : index
    %c0_36 = arith.constant 0 : index
    %72 = vector.load %arg14[%c0_35, %c0_36] : memref<1x3xf32, #tpu.memory_space<vmem>>, vector<1x3xf32>
    %73 = vector.broadcast %72 : vector<1x3xf32> to vector<2x3xf32>
    %74 = arith.addf %71, %73 : vector<2x3xf32>
    %cst_37 = arith.constant 0.000000e+00 : f32
    %75 = vector.broadcast %cst_37 : f32 to vector<2x3xf32>
    %76 = arith.maximumf %74, %75 : vector<2x3xf32>
    %c0_38 = arith.constant 0 : index
    %c0_39 = arith.constant 0 : index
    %77 = vector.load %arg15[%c0_38, %c0_39] : memref<1x3xf32, #tpu.memory_space<vmem>>, vector<1x3xf32>
    %78 = vector.broadcast %77 : vector<1x3xf32> to vector<2x3xf32>
    %79 = arith.mulf %76, %78 : vector<2x3xf32>
    %cst_40 = arith.constant dense<0.000000e+00> : vector<2xf32>
    %80 = vector.multi_reduction <add>, %79, %cst_40 [1] : vector<2x3xf32> to vector<2xf32>
    %81 = vector.shape_cast %80 : vector<2xf32> to vector<2x1xf32>
    %c0_41 = arith.constant 0 : index
    %c0_42 = arith.constant 0 : index
    %82 = vector.load %arg16[%c0_41, %c0_42] : memref<1x1xf32, #tpu.memory_space<vmem>>, vector<1x1xf32>
    %83 = vector.broadcast %82 : vector<1x1xf32> to vector<2x1xf32>
    %84 = arith.addf %81, %83 : vector<2x1xf32>
    %85 = math.exp %84 : vector<2x1xf32>
    %c0_43 = arith.constant 0 : index
    %c0_44 = arith.constant 0 : index
    %c0_45 = arith.constant 0 : index
    %86 = vector.load %arg19[%c0_43, %c0_44, %c0_45] : memref<8x2x8xf32, #tpu.memory_space<vmem>>, vector<8x2x8xf32>
    %87 = vector.shape_cast %55 : vector<2x8xf32> to vector<1x2x8xf32>
    %88 = vector.broadcast %87 : vector<1x2x8xf32> to vector<8x2x8xf32>
    %89 = arith.mulf %86, %88 : vector<8x2x8xf32>
    %cst_46 = arith.constant dense<0.000000e+00> : vector<8x2xf32>
    %90 = vector.multi_reduction <add>, %89, %cst_46 [2] : vector<8x2x8xf32> to vector<8x2xf32>
    %91 = arith.mulf %32, %55 : vector<2x8xf32>
    %cst_47 = arith.constant dense<0.000000e+00> : vector<2xf32>
    %92 = vector.multi_reduction <add>, %91, %cst_47 [1] : vector<2x8xf32> to vector<2xf32>
    %93 = vector.shape_cast %92 : vector<2xf32> to vector<2x1xf32>
    %94 = tpu.transpose %90, [1, 0] : vector<8x2xf32> -> vector<2x8xf32>
    %95 = arith.mulf %33, %93 : vector<2x1xf32>
    %96 = vector.broadcast %95 : vector<2x1xf32> to vector<2x8xf32>
    %97 = arith.mulf %32, %96 : vector<2x8xf32>
    %98 = arith.subf %94, %97 : vector<2x8xf32>
    %99 = arith.mulf %98, %55 : vector<2x8xf32>
    %cst_48 = arith.constant dense<0.000000e+00> : vector<2xf32>
    %100 = vector.multi_reduction <add>, %99, %cst_48 [1] : vector<2x8xf32> to vector<2xf32>
    %101 = vector.shape_cast %100 : vector<2xf32> to vector<2x1xf32>
    %102 = arith.addf %85, %101 : vector<2x1xf32>
    %103 = arith.subf %102, %101 : vector<2x1xf32>
    %104 = tpu.reciprocal %103 : vector<2x1xf32> -> vector<2x1xf32>
    %105 = vector.broadcast %104 : vector<2x1xf32> to vector<2x8xf32>
    %106 = arith.mulf %105, %98 : vector<2x8xf32>
    %cst_49 = arith.constant 0.000000e+00 : f32
    %107 = vector.broadcast %cst_49 : f32 to vector<2x8xf32>
    %108 = arith.subf %107, %106 : vector<2x8xf32>
    %109 = vector.broadcast %11 : vector<1x8xf32> to vector<2x8xf32>
    %110 = arith.mulf %108, %109 : vector<2x8xf32>
    %111 = vector.broadcast %102 : vector<2x1xf32> to vector<2x8xf32>
    %112 = vector.broadcast %9 : vector<1x8xf32> to vector<2x8xf32>
    %113 = arith.mulf %111, %112 : vector<2x8xf32>
    %114 = arith.addf %55, %113 : vector<2x8xf32>
    %115 = vector.broadcast %104 : vector<2x1xf32> to vector<2x8xf32>
    %116 = vector.broadcast %9 : vector<1x8xf32> to vector<2x8xf32>
    %117 = arith.mulf %115, %116 : vector<2x8xf32>
    %118 = arith.addf %110, %117 : vector<2x8xf32>
    %119 = tpu.transpose %114, [1, 0] : vector<2x8xf32> -> vector<8x2xf32>
    %120 = vector.shape_cast %119 : vector<8x2xf32> to vector<8x2x1xf32>
    %c0_50 = arith.constant 0 : index
    %c0_51 = arith.constant 0 : index
    %c0_52 = arith.constant 0 : index
    %121 = vector.load %arg18[%c0_50, %c0_51, %c0_52] : memref<8x2x8xf32, #tpu.memory_space<vmem>>, vector<8x2x8xf32>
    %122 = vector.shape_cast %14 : vector<1x1x8xi1> to vector<1x1x8xi1>
    %123 = vector.broadcast %122 : vector<1x1x8xi1> to vector<8x2x8xi1>
    %124 = vector.shape_cast %120 : vector<8x2x1xf32> to vector<8x2x1xf32>
    %125 = vector.broadcast %124 : vector<8x2x1xf32> to vector<8x2x8xf32>
    %126 = arith.select %123, %125, %121 : vector<8x2x8xi1>, vector<8x2x8xf32>
    %c0_53 = arith.constant 0 : index
    %c0_54 = arith.constant 0 : index
    %c0_55 = arith.constant 0 : index
    %127 = vector.load %arg18[%c0_53, %c0_54, %c0_55] : memref<8x2x8xf32, #tpu.memory_space<vmem>>, vector<8x2x8xf32>
    tpu.vector_store %arg18[%c0_53, %c0_54, %c0_55], %126 {strides = array<i32>} : memref<8x2x8xf32, #tpu.memory_space<vmem>>, vector<8x2x8xf32>,
    %128 = vector.shape_cast %114 : vector<2x8xf32> to vector<1x2x8xf32>
    %129 = arith.index_cast %arg2 : i32 to index
    %c0_56 = arith.constant 0 : index
    %c0_57 = arith.constant 0 : index
    %130 = vector.load %arg18[%129, %c0_56, %c0_57] : memref<8x2x8xf32, #tpu.memory_space<vmem>>, vector<1x2x8xf32>
    tpu.vector_store %arg18[%129, %c0_56, %c0_57], %128 {strides = array<i32>} : memref<8x2x8xf32, #tpu.memory_space<vmem>>, vector<1x2x8xf32>,
    %131 = tpu.transpose %32, [1, 0] : vector<2x8xf32> -> vector<8x2xf32>
    %132 = tpu.transpose %33, [1, 0] : vector<2x1xf32> -> vector<1x2xf32>
    %133 = vector.broadcast %132 : vector<1x2xf32> to vector<8x2xf32>
    %134 = arith.mulf %131, %133 : vector<8x2xf32>
    %135 = vector.shape_cast %134 : vector<8x2xf32> to vector<8x2x1xf32>
    %136 = vector.shape_cast %32 : vector<2x8xf32> to vector<1x2x8xf32>
    %137 = vector.broadcast %135 : vector<8x2x1xf32> to vector<8x2x8xf32>
    %138 = vector.broadcast %136 : vector<1x2x8xf32> to vector<8x2x8xf32>
    %139 = arith.mulf %137, %138 : vector<8x2x8xf32>
    %140 = arith.subf %86, %139 : vector<8x2x8xf32>
    %141 = tpu.transpose %110, [1, 0] : vector<2x8xf32> -> vector<8x2xf32>
    %142 = tpu.transpose %103, [1, 0] : vector<2x1xf32> -> vector<1x2xf32>
    %143 = vector.broadcast %142 : vector<1x2xf32> to vector<8x2xf32>
    %144 = arith.mulf %141, %143 : vector<8x2xf32>
    %145 = vector.shape_cast %144 : vector<8x2xf32> to vector<8x2x1xf32>
    %146 = vector.shape_cast %110 : vector<2x8xf32> to vector<1x2x8xf32>
    %147 = vector.broadcast %145 : vector<8x2x1xf32> to vector<8x2x8xf32>
    %148 = vector.broadcast %146 : vector<1x2x8xf32> to vector<8x2x8xf32>
    %149 = arith.mulf %147, %148 : vector<8x2x8xf32>
    %150 = arith.addf %140, %149 : vector<8x2x8xf32>
    %151 = tpu.transpose %118, [1, 0] : vector<2x8xf32> -> vector<8x2xf32>
    %152 = vector.shape_cast %151 : vector<8x2xf32> to vector<8x2x1xf32>
    %153 = vector.shape_cast %14 : vector<1x1x8xi1> to vector<1x1x8xi1>
    %154 = vector.broadcast %153 : vector<1x1x8xi1> to vector<8x2x8xi1>
    %155 = vector.shape_cast %152 : vector<8x2x1xf32> to vector<8x2x1xf32>
    %156 = vector.broadcast %155 : vector<8x2x1xf32> to vector<8x2x8xf32>
    %157 = arith.select %154, %156, %150 : vector<8x2x8xi1>, vector<8x2x8xf32>
    %c0_58 = arith.constant 0 : index
    %c0_59 = arith.constant 0 : index
    %c0_60 = arith.constant 0 : index
    %158 = vector.load %arg19[%c0_58, %c0_59, %c0_60] : memref<8x2x8xf32, #tpu.memory_space<vmem>>, vector<8x2x8xf32>
    tpu.vector_store %arg19[%c0_58, %c0_59, %c0_60], %157 {strides = array<i32>} : memref<8x2x8xf32, #tpu.memory_space<vmem>>, vector<8x2x8xf32>,
    %159 = vector.shape_cast %118 : vector<2x8xf32> to vector<1x2x8xf32>
    %160 = arith.index_cast %arg2 : i32 to index
    %c0_61 = arith.constant 0 : index
    %c0_62 = arith.constant 0 : index
    %161 = vector.load %arg19[%160, %c0_61, %c0_62] : memref<8x2x8xf32, #tpu.memory_space<vmem>>, vector<1x2x8xf32>
    tpu.vector_store %arg19[%160, %c0_61, %c0_62], %159 {strides = array<i32>} : memref<8x2x8xf32, #tpu.memory_space<vmem>>, vector<1x2x8xf32>,
    %c1_i32 = arith.constant 1 : i32
    %162 = arith.cmpi eq, %arg1, %c1_i32 : i32
    %c7_i32 = arith.constant 7 : i32
    %163 = arith.cmpi eq, %arg2, %c7_i32 : i32
    %164 = arith.andi %162, %163 : i1
    %165 = arith.extui %164 : i1 to i32
    %c0_i32_63 = arith.constant 0 : i32
    %166 = arith.cmpi ne, %165, %c0_i32_63 : i32
    scf.if %166 {
      %c0_64 = arith.constant 0 : index
      %c0_65 = arith.constant 0 : index
      %c0_66 = arith.constant 0 : index
      %167 = vector.load %arg18[%c0_64, %c0_65, %c0_66] : memref<8x2x8xf32, #tpu.memory_space<vmem>>, vector<8x2x8xf32>
      %c0_67 = arith.constant 0 : index
      %c0_68 = arith.constant 0 : index
      %c0_69 = arith.constant 0 : index
      %c0_70 = arith.constant 0 : index
      %168 = vector.load %arg17[%c0_67, %c0_68, %c0_69, %c0_70] : memref<1x8x2x8xf32, #tpu.memory_space<vmem>>, vector<1x8x2x8xf32>
      %169 = vector.shape_cast %168 : vector<1x8x2x8xf32> to vector<8x2x8xf32>
      %170 = vector.shape_cast %167 : vector<8x2x8xf32> to vector<1x8x2x8xf32>
      tpu.vector_store %arg17[%c0_67, %c0_68, %c0_69, %c0_70], %170 {strides = array<i32>} : memref<1x8x2x8xf32, #tpu.memory_space<vmem>>, vector<1x8x2x8xf32>,
    } else {
    }
    return
  }
  func.func @transform_0(%arg0: i32, %arg1: i32, %arg2: i32) -> (i32, i32, i32, i32) {
    %c0_i32 = arith.constant 0 : i32
    %c0_i32_0 = arith.constant 0 : i32
    %c0_i32_1 = arith.constant 0 : i32
    %c0_i32_2 = arith.constant 0 : i32
    return %arg0, %c0_i32, %c0_i32_0, %c0_i32_1 : i32, i32, i32, i32
  }
  func.func @transform_1(%arg0: i32, %arg1: i32, %arg2: i32) -> (i32, i32, i32, i32) {
    %c0_i32 = arith.constant 0 : i32
    %c0_i32_0 = arith.constant 0 : i32
    %c0_i32_1 = arith.constant 0 : i32
    %c0_i32_2 = arith.constant 0 : i32
    return %arg0, %c0_i32, %c0_i32_0, %c0_i32_1 : i32, i32, i32, i32
  }
  func.func @transform_2(%arg0: i32, %arg1: i32, %arg2: i32) -> (i32, i32, i32) {
    %c0_i32 = arith.constant 0 : i32
    %c0_i32_0 = arith.constant 0 : i32
    %c0_i32_1 = arith.constant 0 : i32
    return %arg2, %c0_i32, %c0_i32_0 : i32, i32, i32
  }
  func.func @transform_3(%arg0: i32, %arg1: i32, %arg2: i32) -> (i32, i32) {
    %c0_i32 = arith.constant 0 : i32
    %c0_i32_0 = arith.constant 0 : i32
    %c0_i32_1 = arith.constant 0 : i32
    return %c0_i32, %c0_i32_0 : i32, i32
  }
  func.func @transform_4(%arg0: i32, %arg1: i32, %arg2: i32) -> (i32, i32) {
    %c0_i32 = arith.constant 0 : i32
    %c0_i32_0 = arith.constant 0 : i32
    %c0_i32_1 = arith.constant 0 : i32
    return %c0_i32, %c0_i32_0 : i32, i32
  }
  func.func @transform_5(%arg0: i32, %arg1: i32, %arg2: i32) -> (i32, i32) {
    %c0_i32 = arith.constant 0 : i32
    %c0_i32_0 = arith.constant 0 : i32
    %c0_i32_1 = arith.constant 0 : i32
    return %c0_i32, %c0_i32_0 : i32, i32
  }
  func.func @transform_6(%arg0: i32, %arg1: i32, %arg2: i32) -> (i32, i32, i32) {
    %c0_i32 = arith.constant 0 : i32
    %c0_i32_0 = arith.constant 0 : i32
    %c0_i32_1 = arith.constant 0 : i32
    return %arg2, %c0_i32, %c0_i32_0 : i32, i32, i32
  }
  func.func @transform_7(%arg0: i32, %arg1: i32, %arg2: i32) -> (i32, i32, i32) {
    %c0_i32 = arith.constant 0 : i32
    %c0_i32_0 = arith.constant 0 : i32
    %c0_i32_1 = arith.constant 0 : i32
    return %arg2, %c0_i32, %c0_i32_0 : i32, i32, i32
  }
  func.func @transform_8(%arg0: i32, %arg1: i32, %arg2: i32) -> (i32, i32) {
    %c0_i32 = arith.constant 0 : i32
    %c0_i32_0 = arith.constant 0 : i32
    %c0_i32_1 = arith.constant 0 : i32
    return %c0_i32, %c0_i32_0 : i32, i32
  }
  func.func @transform_9(%arg0: i32, %arg1: i32, %arg2: i32) -> (i32, i32) {
    %c0_i32 = arith.constant 0 : i32
    %c0_i32_0 = arith.constant 0 : i32
    %c0_i32_1 = arith.constant 0 : i32
    return %c0_i32, %c0_i32_0 : i32, i32
  }
  func.func @transform_10(%arg0: i32, %arg1: i32, %arg2: i32) -> (i32, i32) {
    %c0_i32 = arith.constant 0 : i32
    %c0_i32_0 = arith.constant 0 : i32
    %c0_i32_1 = arith.constant 0 : i32
    return %c0_i32, %c0_i32_0 : i32, i32
  }
  func.func @transform_11(%arg0: i32, %arg1: i32, %arg2: i32) -> (i32, i32) {
    %c0_i32 = arith.constant 0 : i32
    %c0_i32_0 = arith.constant 0 : i32
    %c0_i32_1 = arith.constant 0 : i32
    return %c0_i32, %c0_i32_0 : i32, i32
  }
  func.func @transform_12(%arg0: i32, %arg1: i32, %arg2: i32) -> (i32, i32) {
    %c0_i32 = arith.constant 0 : i32
    %c0_i32_0 = arith.constant 0 : i32
    %c0_i32_1 = arith.constant 0 : i32
    return %c0_i32, %c0_i32_0 : i32, i32
  }
  func.func @transform_13(%arg0: i32, %arg1: i32, %arg2: i32) -> (i32, i32) {
    %c0_i32 = arith.constant 0 : i32
    %c0_i32_0 = arith.constant 0 : i32
    %c0_i32_1 = arith.constant 0 : i32
    return %c0_i32, %c0_i32_0 : i32, i32
  }
  func.func @transform_14(%arg0: i32, %arg1: i32, %arg2: i32) -> (i32, i32, i32, i32) {
    %c0_i32 = arith.constant 0 : i32
    %c0_i32_0 = arith.constant 0 : i32
    %c0_i32_1 = arith.constant 0 : i32
    %c0_i32_2 = arith.constant 0 : i32
    return %arg0, %c0_i32, %c0_i32_0, %c0_i32_1 : i32, i32, i32, i32
  }
}

</mosaic_0001>

<bundles_post_ra>
// kernel: custom-call.3
= control target key start
LH: loop header
LB: loop body
LE: loop exit
PB: predicated region body
PF: predicated region fallthrough
CT: control target
= control target key end

     0   :  { %s1740_s30 = smov 0   ;;  %s1742_s10 = smov 0   ;;  %s2067_s0 = inlined_call_operand.vmem [shape: f32[4,4,4], index: 0, kind: input, shape index: {}]   ;;  %s2068_s1 = inlined_call_operand.vmem [shape: f32[4,4,4], index: 1, kind: input, shape index: {}]   ;;  %s2069_s2 = inlined_call_operand.vmem [shape: f32[4,4,4], index: 2, kind: input, shape index: {}]   ;;  %s2070_s3 = inlined_call_operand.vmem [shape: f32[4,4,4], index: 3, kind: input, shape index: {}]   ;;  %s2071_s4 = inlined_call_operand.vmem [shape: f32[4,4], index: 4, kind: output, shape index: {0}]   ;;  %s2072_s5 = inlined_call_operand.vmem [shape: f32[4,4], index: 5, kind: output, shape index: {1}]   ;;  %s2073_s6 = inlined_call_operand.vmem [shape: f32[4,4,4], index: 6, kind: output, shape index: {2}]   ;;  %s2074_s7 = inlined_call_operand.vmem [shape: f32[4,4,4], index: 7, kind: output, shape index: {3}]   ;;  %s2075_s8 = inlined_call_operand.vmem [shape: f32[4,4,4], index: 8, kind: output, shape index: {4}]   ;;  %s2076_s9 = inlined_call_operand.vmem [shape: f32[4,4,4], index: 9, kind: output, shape index: {5}]  }
   0x1   :  { %s1744_s11 = smov 0  }
   0x2 LB: > { %s1756_s12 = sadd.s32 4294967295, %s1677_s11   ;;  %s1759_s13 = sadd.s32 1, %s1677_s11   ;;  %s1677_s11 = sphi %s1744_s11, %s2095_s11   ;;  %s1673_s10 = sphi %s1742_s10, %s2094_s10   ;;  %s1669_s30 = sphi %s1740_s30, %s2093_s30  }
   0x3   : > { %s20_s14 = sshrl.u32 %s1677_s11, 3  ;;  %s21_s15 = sshrl.u32 %s1759_s13, 3 }
   0x4   : > { %s22_s16 = ssub.s32 %s20_s14, %s21_s15  ;;  %s25_s17 = sadd.s32 1, %s1673_s10 }
   0x5   : > { %p23_p0 = scmp.eq.s32.totalorder %s22_s16, 0  ;;  %p35_p1 = scmp.ne.s32.totalorder %s1673_s10, %s1669_s30 }
   0x6   : > { %p36_p2 = scmp.eq.s32.totalorder %s1756_s12, 3  ;;  %p1538_p4 = scmp.ge.s32.totalorder %s1677_s11, 4 }
   0x7   : > { %s1768_s18 = scalar_select %p23_p0, %s1673_s10, %s25_s17  }
   0x8   : > { %p1770_p3 = por %p36_p2, %p35_p1  ;;  %86 = sbr.rel (%p1538_p4) target bundleno = 18 (0x12), region = 16 }
   0x9   : > { %2077 = sst [smem:[#allocation33_spill]] %s1768_s18  ;;  %s88_s20 = sand.u32 (!%p1538_p4), 1, %s1677_s11  }
   0xa   : > { %s1540_s21 = sshll.u32 (!%p1538_p4), %s1677_s11, 2  ;;  %s1539_s22 = sshll.u32 (!%p1538_p4), %s88_s20, 2 }
   0xb   : > { %s92_s25 = scalar_lea.vmem (!%p1538_p4), %s2067_s0, %s1540_s21  ;;  %s90_s26 = scalar_lea.vmem (!%p1538_p4), [#allocation1], %s1539_s22 }
   0xc   : > { %s131_s29 = scalar_lea.vmem (!%p1538_p4), %s2068_s1, %s1540_s21  ;;  %s170_s16 = scalar_lea.vmem (!%p1538_p4), %s2069_s2, %s1540_s21 }
   0xd   : > { %v109_v0 = vld [vmem:[%s92_s25] sm:$0xf]  ;;  %s129_s17 = scalar_lea.vmem [#allocation3], %s1539_s22  ;;  %s209_s23 = scalar_lea.vmem %s2070_s3, %s1540_s21 }
   0xe   : > { %110 = vst [vmem:[%s90_s26] sm:$0xf] %v109_v0  ;;  %v148_v1 = vld [vmem:[%s131_s29] sm:$0xf]  ;;  %s168_s24 = scalar_lea.vmem [#allocation5], %s1539_s22  ;;  %s207_s25 = scalar_lea.vmem [#allocation7], %s1539_s22 }
   0xf   : > { %149 = vst [vmem:[%s129_s17] sm:$0xf] %v148_v1  ;;  %v187_v2 = vld [vmem:[%s170_s16] sm:$0xf] }
  0x10   : > { %188 = vst [vmem:[%s168_s24] sm:$0xf] %v187_v2  ;;  %v226_v3 = vld [vmem:[%s209_s23] sm:$0xf] }
  0x11   : > { %227 = vst [vmem:[%s207_s25] sm:$0xf] %v226_v3 }
  0x12 PF: > { %p1547_p5 = scmp.ge.s32.totalorder %s1677_s11, 1  ;;  %p244_p6 = scmp.lt.s32.totalorder %s1677_s11, 5 }
  0x14   : > { %p245_p7 = pnand %p1547_p5, %p244_p6 }
  0x16   : > { %248 = sbr.rel (%p245_p7) target bundleno = 994 (0x3e2), region = 140 }
  0x1b   : > { %s267_s26 = sand.u32 1, %s1756_s12   ;;  %s285_s27 = sand.u32 1, %s1669_s30   ;;  %v349_v4 = vlaneseq  ;;  %v1687_v5 = vmov 0.0  }
  0x1c   : > { %s1793_s28 = sshll.u32 %s267_s26, 2  ;;  %s1795_s18 = sshll.u32 %s285_s27, 2  ;;  %344 = vst [vmem:[#allocation12] sm:$0xff] %v1687_v5  ;;  %345 = vst [vmem:[#allocation14] sm:$0xff] %v1687_v5 }
  0x1d   : > { %346 = vst [vmem:[#allocation16] sm:$0xff] %v1687_v5  ;;  %347 = vst [vmem:[#allocation18] sm:$0xff] %v1687_v5  ;;  %v1797_v6 = vand.u32 127, %v349_v4  ;;  %v1799_v7 = vshrl.u32 %v349_v4, 7  ;;  %s269_s11 = scalar_lea.vmem [#allocation1], %s1793_s28  ;;  %s273_s30 = scalar_lea.vmem [#allocation3], %s1793_s28 }
  0x1e   : > { %v313_v8 = vld [vmem:[%s269_s11] sm:$0xf]  ;;  %v318_v9 = vld [vmem:[%s273_s30] sm:$0xf]  ;;  %s277_s21 = scalar_lea.vmem [#allocation5], %s1793_s28  ;;  %s281_s22 = scalar_lea.vmem [#allocation7], %s1793_s28 }
  0x1f   : > { %314 = vst [vmem:[#allocation0] sm:$0xf] %v313_v8  ;;  %319 = vst [vmem:[#allocation2] sm:$0xf] %v318_v9  ;;  %v323_v10 = vld [vmem:[%s277_s21] sm:$0xf]  ;;  %v351_v6 = vmov %v1797_v6  ;;  %v354_v7 = vmov %v1799_v7 }
  0x20   : > { %v328_v11 = vld [vmem:[%s281_s22] sm:$0xf]  ;;  %324 = vst [vmem:[#allocation4] sm:$0xf] %v323_v10  ;;  %v364_v6 = vmov %v1797_v6  ;;  %v367_v7 = vmov %v1799_v7  ;;  %s332_s29 = smov [#allocation20]  ;;  %s335_s14 = smov [#allocation21]  ;;  %vm358_vm0 = vcmp.eq.s32.totalorder %v354_v7, %v351_v6 }
  0x21   : > { %329 = vst [vmem:[#allocation6] sm:$0xf] %v328_v11  ;;  %vm371_vm1 = vcmp.eq.s32.totalorder %v367_v7, %v364_v6  ;;  %s348_s15 = smov [#allocation12]  ;;  %s361_s16 = smov [#allocation18]  ;;  %vm1427_vm2 = vcmp.lt.s32.totalorder %v1797_v6, 4  ;;  %v1419_v6 = vmov %v1797_v6  ;;  %v1422_v7 = vmov %v1799_v7 }
  0x22   : > { %s338_s17 = smov [#allocation22]  ;;  %s341_s20 = smov [#allocation23]  ;;  %vm1432_vm3 = vcmp.eq.s32.totalorder %v1422_v7, %v1419_v6  ;;  %v1470_v6 = vmov %v1797_v6  ;;  %v1439_v7 = vmov %v1799_v7 }
  0x23   : > { %v355_v12 = vld [vmem:[%s348_s15] sm:$0xf]  ;;  %s1423_s30 = smov [#allocation20]  ;;  %s1440_s21 = smov [#allocation21]  ;;  %v1436_v6 = vmov %v1797_v6  ;;  %v1473_v7 = vmov %v1799_v7 }
  0x24   : > { %v368_v13 = vld [vmem:[%s361_s16] sm:$0xf]  ;;  %v359_v16 = vsel %vm358_vm0, 1.0, %v355_v12  ;;  %s1457_s22 = smov [#allocation22]  ;;  %v1453_v6 = vmov %v1797_v6  ;;  %v1456_v7 = vmov %v1799_v7  ;;  %vm1483_vm4 = vcmp.eq.s32.totalorder %v1473_v7, %v1470_v6 }
  0x25   : > { %v372_v17 = vsel %vm371_vm1, 1.0, %v368_v13  ;;  %360 = vst [vmem:[%s348_s15] sm:$0xf] %v359_v16 }
  0x26   : > { %v333_v14 = vld [vmem:[#allocation0] sm:$0xff]  ;;  %v336_v15 = vld [vmem:[#allocation2] sm:$0xff]  ;;  %373 = vst [vmem:[%s361_s16] sm:$0xf] %v372_v17 }
  0x27   : > { %334 = vst [vmem:[%s332_s29] sm:$0xff] %v333_v14  ;;  %337 = vst [vmem:[%s335_s14] sm:$0xff] %v336_v15  ;;  %v339_v18 = vld [vmem:[#allocation4] sm:$0xff]  ;;  %s1474_s29 = smov [#allocation23] }
  0x28   : > { %v342_v19 = vld [vmem:[#allocation6] sm:$0xff]  ;;  %340 = vst [vmem:[%s338_s17] sm:$0xff] %v339_v18 }
  0x29   : > { %343 = vst [vmem:[%s341_s20] sm:$0xff] %v342_v19 }
  0x2e   : > { %v1429_v20 = vld [vmem:[%s1423_s30] sm:$0xf] }
  0x2f   : > { %v1446_v21 = vld [vmem:[%s1440_s21] sm:$0xf]  ;;  %v1430_v22 = vsel %vm1427_vm2, %v1429_v20, 0.0 }
  0x30   : > { %v1447_v23 = vsel %vm1427_vm2, %v1446_v21, 0.0  ;;  %v1463_v24 = vld [vmem:[%s1457_s22] sm:$0xf]  ;;  %v1431_v26 = vmul.f32 %v1430_v22, %v1430_v22 }
  0x31   : > { %v1480_v25 = vld [vmem:[%s1474_s29] sm:$0xf]  ;;  %v1448_v27 = vmul.f32 %v1447_v23, %v1447_v23  ;;  %v1464_v28 = vsel %vm1427_vm2, %v1463_v24, 0.0 }
  0x32   : > { %v1481_v29 = vsel %vm1427_vm2, %v1480_v25, 0.0  ;;  %v1465_v30 = vmul.f32 %v1464_v28, %v1464_v28  ;;  %v1433_v33 = vsel %vm1432_vm3, 0.0, %v1431_v26 }
  0x33   : > { %v1450_v31 = vadd.f32 %v1448_v27, %v1431_v26  ;;  %v1482_v32 = vmul.f32 %v1481_v29, %v1481_v29  ;;  %v1449_v34 = vadd.f32 %v1448_v27, %v1433_v33 }
  0x35   : > { %v1467_v35 = vadd.f32 %v1465_v30, %v1450_v31  ;;  %v1466_v36 = vadd.f32 %v1465_v30, %v1449_v34  ;;  %v1484_v37 = vsel %vm1483_vm4, 0.0, %v1482_v32 }
  0x37   : > { %v1486_v38 = vadd.f32 %v1482_v32, %v1467_v35  ;;  %v1485_v39 = vadd.f32 %v1484_v37, %v1466_v36 }
  0x39   : > { %1487 = vadd.xlane.f32.xlu0 %v1486_v38 }
  0x3d   : > { %1495 = vadd.xlane.f32.xlu0 %v1485_v39 }
  0xc2   : > { %v1488_v40 = vpop.xlane.xlu0 %1487 }
  0xc3   : > { %v1489_v41 = vrot.slane %v1488_v40, 4 }
  0xc5   : > { %v1490_v42 = vadd.f32 %v1489_v41, %v1488_v40 }
  0xc6   : > { %v1496_v43 = vpop.xlane.xlu0 %1495 }
  0xc7   : > { %v1491_v44 = vrot.slane %v1490_v42, 2  ;;  %v1497_v45 = vrot.slane %v1496_v43, 4 }
  0xc9   : > { %v1498_v46 = vadd.f32 %v1497_v45, %v1496_v43  ;;  %v1492_v47 = vadd.f32 %v1491_v44, %v1490_v42 }
  0xcb   : > { %v1499_v48 = vrot.slane %v1498_v46, 2  ;;  %v1493_v50 = vrot.slane %v1492_v47, 1 }
  0xcd   : > { %v1500_v49 = vadd.f32 %v1499_v48, %v1498_v46  ;;  %v1494_v53 = vadd.f32 %v1493_v50, %v1492_v47 }
  0xcf   : > { %v1501_v51 = vrot.slane %v1500_v49, 1 }
  0xd1   : > { %v1502_v52 = vadd.f32 %v1501_v51, %v1500_v49 }
  0xd3   : > { %1588 = vpush %v1502_v52 }
  0xd4   : > { %1590 = vpush %v1494_v53 }
 0x104   : > { %s1589_s14 = spop %1588 }
 0x105   : > { %s1591_s15 = spop %1590 }
 0x106   : > { %s1505_s16 = smul.f32 1e-10, %s1591_s15 }
 0x108   : > { %p1506_p8 = scmp.le.f32.partialorder %s1589_s14, %s1505_s16 }
 0x109   : > { %s1833_s17 = smov (!%p1506_p8), 0  }
 0x10a   : > { %1509 = sbr.rel (%p1506_p8) target bundleno = 948 (0x3b4), region = 467 }
 0x10f LB: >> { %s1838_s20 = smov 0   ;;  %s1681_s17 = sphi %s1833_s17, %s2079_s17  }
 0x110 LB: >>> { %s478_s30 = smov [#allocation20]  ;;  %v482_v6 = vmov %v1797_v6  ;;  %v485_v7 = vmov %v1799_v7  ;;  %s498_s21 = smov [#allocation21]  ;;  %vm801_vm14 = vcmp.eq.s32.totalorder %v1799_v7, 0  ;;  %vm813_vm15 = vcmp.eq.s32.totalorder %v1799_v7, 3  ;;  %s1685_s20 = sphi %s1838_s20, %s477_s20  }
 0x111   : >>> { %v502_v6 = vmov %v1797_v6  ;;  %v505_v7 = vmov %v1799_v7  ;;  %v486_v54 = vld [vmem:[%s478_s30] sm:$0xf]  ;;  %vm489_vm5 = vcmp.eq.s32.totalorder %v485_v7, %v482_v6  ;;  %s518_s22 = smov [#allocation23]  ;;  %s479_s29 = smov [#allocation24] }
 0x112   : >>> { %vm509_vm6 = vcmp.eq.s32.totalorder %v505_v7, %v502_v6  ;;  %v522_v6 = vmov %v1797_v6  ;;  %v525_v7 = vmov %v1799_v7  ;;  %v490_v55 = vsel %vm489_vm5, %v486_v54, 0.0  ;;  %v506_v56 = vld [vmem:[%s498_s21] sm:$0xf]  ;;  %s499_s14 = smov [#allocation25]  ;;  %s519_s15 = smov [#allocation26] }
 0x113   : >>> { %vm529_vm7 = vcmp.eq.s32.totalorder %v525_v7, %v522_v6  ;;  %v491_v57 = vrot.slane %v490_v55, 4  ;;  %v510_v58 = vsel %vm509_vm6, %v506_v56, 0.0  ;;  %v526_v59 = vld [vmem:[%s518_s22] sm:$0xf]  ;;  %s542_s16 = smov [#allocation25]  ;;  %s540_s30 = smov [#allocation24]  ;;  %v591_v6 = vmov %v1797_v6 }
 0x114   : >>> { %v511_v60 = vrot.slane %v510_v58, 4  ;;  %v530_v61 = vsel %vm529_vm7, %v526_v59, 0.0  ;;  %s544_s21 = smov [#allocation26]  ;;  %s579_s22 = smov [#allocation27]  ;;  %v594_v7 = vmov %v1799_v7  ;;  %v606_v6 = vmov %v1797_v6 }
 0x115   : >>> { %v492_v62 = vadd.f32 %v491_v57, %v490_v55  ;;  %v531_v63 = vrot.slane %v530_v61, 4  ;;  %v609_v7 = vmov %v1799_v7  ;;  %vm596_vm12 = vcmp.eq.s32.totalorder %v594_v7, %v591_v6  ;;  %s1857_s24 = smov [#allocation22]  ;;  %s1863_s23 = smov [#allocation14] }
 0x116   : >>> { %v512_v0 = vadd.f32 %v511_v60, %v510_v58  ;;  %vm611_vm13 = vcmp.eq.s32.totalorder %v609_v7, %v606_v6  ;;  %s841_s11 = smov [#allocation31]  ;;  %s1869_s27 = smov [#allocation18]  ;;  %v627_v55 = vld [vmem:[%s1857_s24] sm:$0xf]  ;;  %v704_v6 = vmov %v1797_v6  ;;  %v707_v7 = vmov %v1799_v7 }
 0x117   : >>> { %v493_v1 = vrot.slane %v492_v62, 2  ;;  %v532_v2 = vadd.f32 %v531_v63, %v530_v61  ;;  %v850_v58 = vld [vmem:[%s1863_s23] sm:$0xf]  ;;  %s619_s26 = smov [#allocation32]  ;;  %s843_s25 = smov [#allocation32]  ;;  %v718_v6 = vmov %v1797_v6  ;;  %v721_v7 = vmov %v1799_v7 }
 0x118   : >>> { %v513_v3 = vrot.slane %v512_v0, 2  ;;  %v852_v61 = vld [vmem:[%s1869_s27] sm:$0xf]  ;;  %vm711_vm0 = vcmp.eq.s32.totalorder %v707_v7, %v704_v6  ;;  %v677_v6 = vmov %v1797_v6  ;;  %v680_v7 = vmov %v1799_v7  ;;  %s477_s20 = sadd.s32 1, %s1685_s20  }
 0x119   : >>> { %v494_v4 = vadd.f32 %v493_v1, %v492_v62  ;;  %v533_v5 = vrot.slane %v532_v2, 2  ;;  %v691_v6 = vmov %v1797_v6  ;;  %v694_v7 = vmov %v1799_v7  ;;  %p474_p9 = scmp.ge.s32.totalorder %s477_s20, 7  }
 0x11a   : >>> { %v514_v8 = vadd.f32 %v513_v3, %v512_v0  ;;  %vm726_vm1 = vcmp.eq.s32.totalorder %v721_v7, %v718_v6  ;;  %vm685_vm3 = vcmp.eq.s32.totalorder %v680_v7, %v677_v6  ;;  %vm698_vm4 = vcmp.eq.s32.totalorder %v694_v7, %v691_v6 }
 0x11b   : >>> { %v495_v9 = vrot.slane %v494_v4, 1  ;;  %v534_v10 = vadd.f32 %v533_v5, %v532_v2  ;;  %vm740_vm5 = vcmp.eq.s32.totalorder %v1797_v6, 0  ;;  %vm744_vm6 = vcmp.eq.s32.totalorder %v1797_v6, 1 }
 0x11c   : >>> { %v515_v11 = vrot.slane %v514_v8, 1  ;;  %vm757_vm7 = vcmp.eq.s32.totalorder %v1797_v6, 3  ;;  %v378_v6 = vmov (%p474_p9), %v1797_v6  ;;  %v381_v7 = vmov (%p474_p9), %v1799_v7 }
 0x11d   : >>> { %v496_v12 = vadd.f32 %v495_v9, %v494_v4  ;;  %v535_v13 = vrot.slane %v534_v10, 1  ;;  %v431_v6 = vmov (%p474_p9), %v1797_v6 }
 0x11e   : >>> { %v516_v14 = vadd.f32 %v515_v11, %v514_v8 }
 0x11f   : >>> { %497 = vst [vmem:[%s479_s29] sm:$0x1] %v496_v12  ;;  %v536_v15 = vadd.f32 %v535_v13, %v534_v10  ;;  %s581_s29 = smov [#allocation28] }
 0x120   : >>> { %517 = vst [vmem:[%s499_s14] sm:$0x1] %v516_v14  ;;  %s538_s14 = smov [#allocation29] }
 0x121   : >>> { %537 = vst [vmem:[%s519_s15] sm:$0x1] %v536_v15  ;;  %s539_s15 = smov [#allocation30]  ;;  %s583_s14 = smov %s538_s14 }
 0x122   : >>> { %s585_s15 = smov %s539_s15 }
 0x126   : >>> { %v541_v18 = vld [vmem:[%s540_s30] sm:$0xff]  ;;  %s602_s30 = smov [#allocation30] }
 0x127   : >>> { %v543_v16 = vld [vmem:[%s542_s16] sm:$0xff]  ;;  %v564_v33 = vand.u32 2147483647, %v541_v18  ;;  %s587_s16 = smov [#allocation29] }
 0x128   : >>> { %v547_v17 = vmul.f32 2.0, %v543_v16  ;;  %v545_v19 = vld [vmem:[%s544_s21] sm:$0xff]  ;;  %v565_v36 = vand.u32 2147483647, %v543_v16  ;;  %s600_s21 = smov [#allocation31] }
 0x129   : >>> { %v546_v20 = vsub.f32 %v545_v19, %v541_v18  ;;  %v566_v34 = vand.u32 2147483647, %v545_v19 }
 0x12a   : >>> { %1639 = vrcp.f32 %v547_v17 }
 0x12b   : >>> { %v567_v35 = vmin.f32 %v564_v33, %v566_v34 }
 0x12d   : >>> { %v568_v37 = vmul.f32 1.1920929e-08, %v567_v35 }
 0x12f   : >>> { %vm569_vm11 = vcmp.le.f32.partialorder %v565_v36, %v568_v37 }
 0x137   : >>> { %v1640_v21 = vpop.eup %1639 }
 0x138   : >>> { %v549_v22 = vmul.f32 %v1640_v21, %v546_v20 }
 0x13a   : >>> { %v551_v23 = vmul.f32 %v549_v22, %v549_v22  ;;  %vm550_vm10 = vcmp.ge.f32.partialorder %v549_v22, 0.0 }
 0x13c   : >>> { %v552_v24 = vadd.f32 1.0, %v551_v23 }
 0x13e   : >>> { %1641 = vrsqrt.f32 %v552_v24  ;;  %vm555_vm8 = vcmp.eq.f32.partialorder %v552_v24, inf  ;;  %v558_v26 = vand.u32 2147483648, %v552_v24  ;;  %vm557_vm9 = vcmp.eq.f32.partialorder %v552_v24, 0.0 }
 0x14b   : >>> { %v1642_v25 = vpop.eup %1641 }
 0x14c   : >>> { %v554_v27 = vmul.f32 %v1642_v25, %v552_v24 }
 0x14e   : >>> { %v556_v28 = vsel %vm555_vm8, %v552_v24, %v554_v27  ;;  %vm393_vm8 = vcmp.eq.s32.totalorder (%p474_p9), %v381_v7, %v378_v6  ;;  %v434_v7 = vmov (%p474_p9), %v1799_v7  ;;  %v397_v6 = vmov (%p474_p9), %v1797_v6 }
 0x14f   : >>> { %v559_v29 = vsel %vm557_vm9, %v558_v26, %v556_v28  ;;  %v400_v7 = vmov (%p474_p9), %v1799_v7  ;;  %v414_v6 = vmov (%p474_p9), %v1797_v6  ;;  %vm446_vm9 = vcmp.eq.s32.totalorder (%p474_p9), %v434_v7, %v431_v6 }
 0x150   : >>> { %v560_v30 = vxor.u32 2147483648, %v559_v29  ;;  %v417_v7 = vmov (%p474_p9), %v1799_v7 }
 0x152   : >>> { %v561_v31 = vsel %vm550_vm10, %v559_v29, %v560_v30 }
 0x153   : >>> { %v562_v32 = vadd.f32 %v561_v31, %v549_v22 }
 0x155   : >>> { %1643 = vrcp.f32 %v562_v32 }
 0x162   : >>> { %v1644_v38 = vpop.eup %1643 }
 0x163   : >>> { %v570_v39 = vsel %vm569_vm11, 0.0, %v1644_v38 }
 0x164   : >>> { %v571_v40 = vmul.f32 %v570_v39, %v570_v39  ;;  %v575_v41 = vmul.f32 %v570_v39, %v543_v16 }
 0x166   : >>> { %v572_v42 = vadd.f32 1.0, %v571_v40  ;;  %v576_v43 = vsub.f32 %v541_v18, %v575_v41  ;;  %v578_v44 = vadd.f32 %v575_v41, %v545_v19 }
 0x168   : >>> { %1645 = vrsqrt.f32 %v572_v42  ;;  %580 = vst [vmem:[%s579_s22] sm:$0xff] %v576_v43  ;;  %582 = vst [vmem:[%s581_s29] sm:$0xff] %v578_v44  ;;  %s617_s22 = smov [#allocation31]  ;;  %s1853_s29 = smov [#allocation20] }
 0x169   : >>> { %v625_v53 = vld [vmem:[%s1853_s29] sm:$0xf] }
 0x175   : >>> { %v1646_v45 = vpop.eup %1645 }
 0x176   : >>> { %584 = vst [vmem:[%s583_s14] sm:$0xff] %v1646_v45  ;;  %v574_v46 = vmul.f32 %v1646_v45, %v570_v39  ;;  %s615_s14 = smov [#allocation32] }
 0x178   : >>> { %586 = vst [vmem:[%s585_s15] sm:$0xff] %v574_v46  ;;  %s1855_s15 = smov [#allocation21] }
 0x179   : >>> { %v626_v54 = vld [vmem:[%s1855_s15] sm:$0xf] }
 0x17d   : >>> { %v588_v47 = vld [vmem:[%s587_s16] ss:$0 sm:$0xff]  ;;  %s1859_s16 = smov [#allocation23] }
 0x17e   : >>> { %v597_v48 = vsel %vm596_vm12, %v588_v47, 0.0  ;;  %v628_v56 = vld [vmem:[%s1859_s16] sm:$0xf] }
 0x17f   : >>> { %598 = vadd.xlane.f32.xlu0 %v597_v48  ;;  %v603_v49 = vld [vmem:[%s602_s30] ss:$0 sm:$0xff]  ;;  %s1861_s30 = smov [#allocation12] }
 0x180   : >>> { %v612_v50 = vsel %vm611_vm13, %v603_v49, 0.0  ;;  %v849_v57 = vld [vmem:[%s1861_s30] sm:$0xf] }
 0x183   : >>> { %613 = vadd.xlane.f32.xlu0 %v612_v50 }
 0x208   : >>> { %v599_v51 = vpop.xlane.xlu0 %598 }
 0x209   : >>> { %601 = vst [vmem:[%s600_s21] sm:$0xff] %v599_v51  ;;  %s1865_s21 = smov [#allocation16] }
 0x20a   : >>> { %v851_v59 = vld [vmem:[%s1865_s21] sm:$0xf] }
 0x20c   : >>> { %v614_v52 = vpop.xlane.xlu0 %613 }
 0x20d   : >>> { %616 = vst [vmem:[%s615_s14] sm:$0xff] %v614_v52  ;;  %s1889_s14 = smov [#allocation23] }
 0x210   : >>> { %v618_v60 = vld [vmem:[%s617_s22] sm:$0xff]  ;;  %s1887_s22 = smov [#allocation22] }
 0x211   : >>> { %v842_v62 = vld [vmem:[%s841_s11] sm:$0xff]  ;;  %v629_v63 = vmul.f32 %v625_v53, %v618_v60  ;;  %v632_v0 = vmul.f32 %v626_v54, %v618_v60  ;;  %v636_v1 = vmul.f32 %v627_v55, %v618_v60  ;;  %v639_v2 = vmul.f32 %v628_v56, %v618_v60  ;;  %s1885_s11 = smov [#allocation12] }
 0x212   : >>> { %v853_v3 = vmul.f32 %v849_v57, %v842_v62  ;;  %v856_v4 = vmul.f32 %v850_v58, %v842_v62  ;;  %v860_v5 = vmul.f32 %v851_v59, %v842_v62  ;;  %v863_v8 = vmul.f32 %v852_v61, %v842_v62 }
 0x214   : >>> { %v620_v9 = vld [vmem:[%s619_s26] sm:$0xff]  ;;  %s647_s26 = smov [#allocation30] }
 0x215   : >>> { %v844_v10 = vld [vmem:[%s843_s25] sm:$0xff]  ;;  %v630_v11 = vmul.f32 %v627_v55, %v620_v9  ;;  %v633_v12 = vmul.f32 %v628_v56, %v620_v9  ;;  %v635_v13 = vmul.f32 %v625_v53, %v620_v9  ;;  %v638_v14 = vmul.f32 %v626_v54, %v620_v9  ;;  %s645_s25 = smov [#allocation29] }
 0x216   : >>> { %v854_v15 = vmul.f32 %v851_v59, %v844_v10  ;;  %v857_v16 = vmul.f32 %v852_v61, %v844_v10  ;;  %v859_v17 = vmul.f32 %v849_v57, %v844_v10  ;;  %v862_v18 = vmul.f32 %v850_v58, %v844_v10  ;;  %v646_v27 = vld [vmem:[%s645_s25] ss:$0 sm:$0xff]  ;;  %s674_s25 = smov [#allocation27] }
 0x217   : >>> { %v631_v19 = vsub.f32 %v629_v63, %v630_v11  ;;  %v634_v20 = vsub.f32 %v632_v0, %v633_v12  ;;  %v637_v21 = vadd.f32 %v636_v1, %v635_v13  ;;  %v640_v22 = vadd.f32 %v639_v2, %v638_v14  ;;  %v648_v28 = vld [vmem:[%s647_s26] ss:$0 sm:$0xff]  ;;  %s673_s26 = smov [#allocation20] }
 0x218   : >>> { %v855_v23 = vsub.f32 %v853_v3, %v854_v15  ;;  %v858_v24 = vsub.f32 %v856_v4, %v857_v16  ;;  %v861_v25 = vadd.f32 %v860_v5, %v859_v17  ;;  %v864_v26 = vadd.f32 %v863_v8, %v862_v18  ;;  %v681_v63 = vld [vmem:[%s674_s25] ss:$0 sm:$0xff]  ;;  %s917_s25 = sadd.s32 (%p474_p9), 1, %s1681_s17  }
 0x219   : >>> { %642 = vst [vmem:[%s1855_s15] sm:$0xf] %v634_v20  ;;  %644 = vst [vmem:[%s1859_s16] sm:$0xf] %v640_v22  ;;  %s1891_s15 = smov [#allocation20]  ;;  %s715_s16 = smov [#allocation28] }
 0x21a   : >>> { %641 = vst [vmem:[%s1853_s29] sm:$0xf] %v631_v19  ;;  %643 = vst [vmem:[%s1857_s24] sm:$0xf] %v637_v21  ;;  %s1893_s24 = smov [#allocation16]  ;;  %s1901_s29 = smov [#allocation21]  ;;  %v722_v59 = vld [vmem:[%s715_s16] ss:$0 sm:$0xff] }
 0x21b   : >>> { %865 = vst [vmem:[%s1861_s30] sm:$0xf] %v855_v23  ;;  %866 = vst [vmem:[%s1863_s23] sm:$0xf] %v858_v24  ;;  %s1895_s23 = smov [#allocation14]  ;;  %s701_s30 = smov [#allocation22] }
 0x21c   : >>> { %867 = vst [vmem:[%s1865_s21] sm:$0xf] %v861_v25  ;;  %868 = vst [vmem:[%s1869_s27] sm:$0xf] %v864_v26  ;;  %s1899_s27 = smov [#allocation18]  ;;  %s714_s21 = smov [#allocation23] }
 0x21d   : >>> { %s817_s16 = smov [#allocation21]  ;;  %p470_p10 = scmp.ge.s32.totalorder (%p474_p9), %s917_s25, 15 }
 0x21e   : >> { %s2079_s17 = smov (%p474_p9), %s917_s25 }
 0x220   : >>> { %v656_v30 = vld [vmem:[%s1889_s14] sm:$0xf] }
 0x221   : >>> { %v655_v29 = vld [vmem:[%s1887_s22] sm:$0xf]  ;;  %v664_v36 = vmul.f32 %v656_v30, %v648_v28  ;;  %v667_v42 = vmul.f32 %v656_v30, %v646_v27 }
 0x222   : >>> { %v653_v31 = vld [vmem:[%s1891_s15] sm:$0xf]  ;;  %v663_v35 = vmul.f32 %v655_v29, %v646_v27  ;;  %v666_v37 = vmul.f32 %v655_v29, %v648_v28 }
 0x223   : >>> { %v871_v32 = vld [vmem:[%s1885_s11] ss:$0 sm:$0xff]  ;;  %v1567_v34 = vld [vmem:[%s1885_s11 + $0x3] ss:$0 sm:$0xff]  ;;  %v657_v48 = vmul.f32 %v653_v31, %v646_v27  ;;  %v660_v49 = vmul.f32 %v653_v31, %v648_v28 }
 0x224   : >>> { %v1566_v33 = vld [vmem:[%s1885_s11 - $0x1] sm:$0xe]  ;;  %v1571_v45 = vld [vmem:[%s1895_s23 + $0x3] ss:$0 sm:$0xff]  ;;  %v665_v47 = vsub.f32 %v663_v35, %v664_v36  ;;  %v668_v53 = vadd.f32 %v667_v42, %v666_v37 }
 0x225   : >>> { %v878_v38 = vsel %vm801_vm14, %v871_v32, %v1566_v33  ;;  %v882_v39 = vld [vmem:[%s1893_s24] ss:$0 sm:$0xff]  ;;  %v1569_v40 = vld [vmem:[%s1893_s24 + $0x1] sm:$0x7] }
 0x226   : >>> { %v895_v41 = vld [vmem:[%s1895_s23] ss:$0 sm:$0xff]  ;;  %881 = vst [vmem:[%s1885_s11] sm:$0xf] %v878_v38  ;;  %v890_v43 = vsel %vm813_vm15, %v1567_v34, %v1569_v40  ;;  %v1573_v51 = vld [vmem:[%s1899_s27 + $0x1] sm:$0x7]  ;;  %671 = vst [vmem:[%s1887_s22] sm:$0xf] %v665_v47 }
 0x227   : >>> { %v1570_v44 = vld [vmem:[%s1895_s23 - $0x1] sm:$0xe]  ;;  %1568 = vst [vmem:[%s1885_s11 + $0x1] sm:$0x1] %v882_v39  ;;  %892 = vst [vmem:[%s1893_s24] sm:$0xf] %v890_v43  ;;  %v914_v54 = vsel %vm813_vm15, %v1571_v45, %v1573_v51  ;;  %s688_s11 = smov [#allocation21] }
 0x228   : >>> { %v906_v46 = vld [vmem:[%s1899_s27] ss:$0 sm:$0xff]  ;;  %v902_v50 = vsel %vm801_vm14, %v895_v41, %v1570_v44  ;;  %672 = vst [vmem:[%s1889_s14] sm:$0xf] %v668_v53  ;;  %s1943_s22 = smov [#allocation22]  ;;  %s1688_s14 = smov 1  }
 0x229   : >>> { %v654_v52 = vld [vmem:[%s1901_s29] sm:$0xf]  ;;  %905 = vst [vmem:[%s1895_s23] sm:$0xf] %v902_v50  ;;  %916 = vst [vmem:[%s1899_s27] sm:$0xf] %v914_v54  ;;  %s730_s24 = smov [#allocation21]  ;;  %s1946_s27 = smov [#allocation23] }
 0x22a   : >>> { %v658_v55 = vmul.f32 %v654_v52, %v648_v28  ;;  %v661_v56 = vmul.f32 %v654_v52, %v646_v27  ;;  %1572 = vst [vmem:[%s1895_s23 + $0x1] sm:$0x1] %v906_v46  ;;  %s1689_s23 = smov 127  }
 0x22c   : >>> { %v659_v57 = vsub.f32 %v657_v48, %v658_v55  ;;  %v662_v58 = vadd.f32 %v661_v56, %v660_v49 }
 0x22d   : >>> { %v708_v60 = vld [vmem:[%s701_s30] sm:$0xf] }
 0x22e   : >>> { %669 = vst [vmem:[%s1891_s15] sm:$0xf] %v659_v57  ;;  %670 = vst [vmem:[%s1901_s29] sm:$0xf] %v662_v58  ;;  %v712_v61 = vsel %vm711_vm0, 0.0, %v708_v60  ;;  %s729_s15 = smov [#allocation20]  ;;  %s793_s29 = smov [#allocation20] }
 0x22f   : >>> { %v723_v62 = vld [vmem:[%s714_s21] sm:$0xf]  ;;  %713 = vst [vmem:[%s701_s30] sm:$0xf] %v712_v61  ;;  %s794_s30 = smov [#allocation22] }
 0x230   : >>> { %v727_v0 = vsel %vm726_vm1, %v722_v59, %v723_v62 }
 0x231   : >>> { %728 = vst [vmem:[%s714_s21] sm:$0xf] %v727_v0  ;;  %s818_s21 = smov [#allocation23] }
 0x235   : >>> { %v682_v1 = vld [vmem:[%s673_s26] sm:$0xf] }
 0x236   : >>> { %v695_v2 = vld [vmem:[%s688_s11] sm:$0xf]  ;;  %v686_v3 = vsel %vm685_vm3, %v681_v63, %v682_v1 }
 0x237   : >>> { %v699_v4 = vsel %vm698_vm4, 0.0, %v695_v2  ;;  %687 = vst [vmem:[%s673_s26] sm:$0xf] %v686_v3  ;;  %v767_v5 = vld [vmem:[%s1943_s22] sm:$0xf]  ;;  %s382_s26 = smov (%p474_p9), [#allocation20] }
 0x238   : >>> { %700 = vst [vmem:[%s688_s11] sm:$0xf] %v699_v4  ;;  %768 = vrot.lane.b32.xlu0 %v767_v5, %s1688_s14  ;;  %v763_v11 = vld [vmem:[%s1946_s27] sm:$0xf]  ;;  %s401_s11 = smov (%p474_p9), [#allocation21] }
 0x239   : >>> { %v784_v12 = vld [vmem:[%s1946_s27] sm:$0xf] }
 0x23a   : >>> { %v766_v30 = vld [vmem:[%s1943_s22] sm:$0xf] }
 0x23e   : >>> { %v735_v8 = vld [vmem:[%s729_s15] sm:$0xf] }
 0x23f   : >>> { %736 = vrot.lane.b32.xlu1 %v735_v8, %s1688_s14  ;;  %v731_v9 = vld [vmem:[%s730_s24] sm:$0xf] }
 0x240   : >>> { %v752_v10 = vld [vmem:[%s730_s24] sm:$0xf] }
 0x241   : >>> { %v734_v18 = vld [vmem:[%s729_s15] sm:$0xf] }
 0x243   : >>> { %732 = vrot.lane.b32.xlu1 %v731_v9, %s1688_s14 }
 0x247   : >>> { %753 = vrot.lane.b32.xlu1 %v752_v10, %s1689_s23 }
 0x24b   : >>> { %764 = vrot.lane.b32.xlu1 %v763_v11, %s1688_s14  ;;  %s435_s14 = smov (%p474_p9), [#allocation23] }
 0x24f   : >>> { %785 = vrot.lane.b32.xlu1 %v784_v12, %s1689_s23 }
 0x2aa   : >>> { %v769_v20 = vpop.permute.xlu0 %768 }
 0x2ab   : >>> { %v773_v22 = vsel %vm740_vm5, %v767_v5, %v769_v20 }
 0x2b1   : >>> { %v737_v13 = vpop.permute.xlu1 %736 }
 0x2b2   : >>> { %v741_v14 = vsel %vm740_vm5, %v735_v8, %v737_v13 }
 0x2b5   : >>> { %v733_v15 = vpop.permute.xlu1 %732 }
 0x2b6   : >>> { %v745_v16 = vsel %vm744_vm6, %v733_v15, %v741_v14 }
 0x2b7   : >>> { %v751_v17 = vsel %vm1427_vm2, %v745_v16, 0.0 }
 0x2b8   : >>> { %759 = vst [vmem:[%s729_s15] sm:$0xf] %v751_v17 }
 0x2b9   : >>> { %v754_v19 = vpop.permute.xlu1 %753 }
 0x2ba   : >>> { %v758_v21 = vsel %vm757_vm7, %v734_v18, %v754_v19 }
 0x2bb   : >>> { %760 = vst [vmem:[%s730_s24] sm:$0xf] %v758_v21 }
 0x2bd   : >>> { %v765_v23 = vpop.permute.xlu1 %764 }
 0x2be   : >>> { %v777_v24 = vsel %vm744_vm6, %v765_v23, %v773_v22 }
 0x2bf   : >>> { %v795_v25 = vld [vmem:[%s793_s29] ss:$0 sm:$0xff]  ;;  %v1559_v27 = vld [vmem:[%s793_s29 + $0x3] ss:$0 sm:$0xff]  ;;  %v783_v29 = vsel %vm1427_vm2, %v777_v24, 0.0 }
 0x2c0   : >>> { %v1558_v26 = vld [vmem:[%s793_s29 - $0x1] sm:$0xe]  ;;  %791 = vst [vmem:[%s1943_s22] sm:$0xf] %v783_v29  ;;  %s418_s22 = smov (%p474_p9), [#allocation22] }
 0x2c1   : >>> { %v802_v28 = vsel %vm801_vm14, %v795_v25, %v1558_v26  ;;  %v786_v31 = vpop.permute.xlu1 %785 }
 0x2c2   : >>> { %805 = vst [vmem:[%s793_s29] sm:$0xf] %v802_v28  ;;  %v819_v32 = vld [vmem:[%s817_s16] ss:$0 sm:$0xff]  ;;  %v1563_v34 = vld [vmem:[%s817_s16 + $0x3] ss:$0 sm:$0xff]  ;;  %v790_v35 = vsel %vm757_vm7, %v766_v30, %v786_v31 }
 0x2c3   : >>> { %v1562_v33 = vld [vmem:[%s817_s16 - $0x1] sm:$0xe]  ;;  %792 = vst [vmem:[%s1946_s27] sm:$0xf] %v790_v35 }
 0x2c4   : >>> { %v826_v36 = vsel %vm801_vm14, %v819_v32, %v1562_v33 }
 0x2c5   : >>> { %829 = vst [vmem:[%s817_s16] sm:$0xf] %v826_v36 }
 0x2c7   : >>> { %v806_v37 = vld [vmem:[%s794_s30] ss:$0 sm:$0xff]  ;;  %v1561_v38 = vld [vmem:[%s794_s30 + $0x1] sm:$0x7] }
 0x2c8   : >>> { %1560 = vst [vmem:[%s793_s29 + $0x1] sm:$0x1] %v806_v37  ;;  %v814_v39 = vsel %vm813_vm15, %v1559_v27, %v1561_v38 }
 0x2c9   : >>> { %816 = vst [vmem:[%s794_s30] sm:$0xf] %v814_v39 }
 0x2ca   : >>> { %v830_v40 = vld [vmem:[%s818_s21] ss:$0 sm:$0xff]  ;;  %v1565_v41 = vld [vmem:[%s818_s21 + $0x1] sm:$0x7] }
 0x2cb   : >>> { %1564 = vst [vmem:[%s817_s16 + $0x1] sm:$0x1] %v830_v40  ;;  %v838_v42 = vsel %vm813_vm15, %v1563_v34, %v1565_v41 }
 0x2cc   : >>> { %840 = vst [vmem:[%s818_s21] sm:$0xf] %v838_v42  ;;  %476 = sbr.rel (!%p474_p9) target bundleno = 272 (0x110), region = 462 }
 0x2cf   : >> { %v388_v43 = vld [vmem:[%s382_s26] sm:$0xf] (%p474_p9) }
 0x2d0   : >> { %v389_v45 = vsel (%p474_p9), %vm1427_vm2, %v388_v43, 0.0  ;;  %v424_v47 = vld [vmem:[%s418_s22] sm:$0xf] (%p474_p9) }
 0x2d1   : >> { %v390_v49 = vmul.f32 %v389_v45, %v389_v45  ;;  %v425_v51 = vsel %vm1427_vm2, %v424_v47, 0.0 }
 0x2d2   : >> { %v407_v44 = vld [vmem:[%s401_s11] sm:$0xf]  ;;  %v426_v53 = vmul.f32 %v425_v51, %v425_v51 }
 0x2d3   : >> { %v408_v46 = vsel %vm1427_vm2, %v407_v44, 0.0  ;;  %v441_v48 = vld [vmem:[%s435_s14] sm:$0xf]  ;;  %v394_v56 = vsel %vm393_vm8, 0.0, %v390_v49 }
 0x2d4   : >> { %v409_v50 = vmul.f32 %v408_v46, %v408_v46  ;;  %v442_v52 = vsel %vm1427_vm2, %v441_v48, 0.0 }
 0x2d5   : >> { %v443_v55 = vmul.f32 %v442_v52, %v442_v52 }
 0x2d6   : >> { %v411_v54 = vadd.f32 %v409_v50, %v390_v49  ;;  %v410_v57 = vadd.f32 %v409_v50, %v394_v56 }
 0x2d7   : >> { %v447_v60 = vsel %vm446_vm9, 0.0, %v443_v55 }
 0x2d8   : >> { %v428_v58 = vadd.f32 %v426_v53, %v411_v54  ;;  %v427_v59 = vadd.f32 %v426_v53, %v410_v57 }
 0x2da   : >> { %v449_v61 = vadd.f32 %v443_v55, %v428_v58  ;;  %v448_v62 = vadd.f32 %v447_v60, %v427_v59 }
 0x2dc   : >> { %450 = vadd.xlane.f32.xlu0 %v449_v61 }
 0x2e0   : >> { %458 = vadd.xlane.f32.xlu0 %v448_v62 }
 0x365   : >> { %v451_v63 = vpop.xlane.xlu0 %450 }
 0x366   : >> { %v452_v0 = vrot.slane %v451_v63, 4 }
 0x368   : >> { %v453_v1 = vadd.f32 %v452_v0, %v451_v63 }
 0x369   : >> { %v459_v2 = vpop.xlane.xlu0 %458 }
 0x36a   : >> { %v454_v3 = vrot.slane %v453_v1, 2  ;;  %v460_v4 = vrot.slane %v459_v2, 4 }
 0x36c   : >> { %v461_v5 = vadd.f32 %v460_v4, %v459_v2  ;;  %v455_v8 = vadd.f32 %v454_v3, %v453_v1 }
 0x36e   : >> { %v462_v9 = vrot.slane %v461_v5, 2  ;;  %v456_v11 = vrot.slane %v455_v8, 1 }
 0x370   : >> { %v463_v10 = vadd.f32 %v462_v9, %v461_v5  ;;  %v457_v14 = vadd.f32 %v456_v11, %v455_v8 }
 0x372   : >> { %v464_v12 = vrot.slane %v463_v10, 1 }
 0x374   : >> { %v465_v13 = vadd.f32 %v464_v12, %v463_v10 }
 0x376   : >> { %1592 = vpush %v465_v13 }
 0x377   : >> { %1594 = vpush %v457_v14 }
 0x3a7   : >> { %s1593_s20 = spop %1592 }
 0x3a8   : >> { %s1595_s15 = spop %1594 }
 0x3a9   : >> { %s468_s24 = smul.f32 1e-10, %s1595_s15 }
 0x3ab   : >> { %p469_p11 = scmp.le.f32.partialorder %s1593_s20, %s468_s24 }
 0x3ad   : >> { %p471_p12 = por %p470_p10, %p469_p11 }
 0x3af   : > { %919 = sbr.rel (!%p471_p12) target bundleno = 271 (0x10f), region = 473 }
 0x3b4 PF: > { %s924_s23 = smov [#allocation20]  ;;  %v928_v6 = vmov %v1797_v6  ;;  %v931_v7 = vmov %v1799_v7  ;;  %v984_v15 = vld [vmem:[#allocation12] sm:$0xf]  ;;  %v992_v16 = vld [vmem:[#allocation14] sm:$0xf]  ;;  %s2080_s17 = scalar_lea.vmem [#allocation13], %s1793_s28 }
 0x3b5   : > { %v948_v6 = vmov %v1797_v6  ;;  %v951_v7 = vmov %v1799_v7  ;;  %v932_v17 = vld [vmem:[%s924_s23] sm:$0xf]  ;;  %vm935_vm10 = vcmp.eq.s32.totalorder %v931_v7, %v928_v6  ;;  %987 = vst [vmem:[%s2080_s17] sm:$0xf] %v984_v15  ;;  %s2081_s27 = scalar_lea.vmem [#allocation15], %s1793_s28  ;;  %s944_s29 = smov [#allocation23] }
 0x3b6   : > { %vm955_vm11 = vcmp.eq.s32.totalorder %v951_v7, %v948_v6  ;;  %995 = vst [vmem:[%s2081_s27] sm:$0xf] %v992_v16  ;;  %v1000_v18 = vld [vmem:[#allocation16] sm:$0xf]  ;;  %v936_v19 = vsel %vm935_vm10, %v932_v17, 0.0  ;;  %s2082_s16 = scalar_lea.vmem [#allocation17], %s1793_s28  ;;  %s2083_s30 = scalar_lea.vmem [#allocation19], %s1793_s28 }
 0x3b7   : > { %1003 = vst [vmem:[%s2082_s16] sm:$0xf] %v1000_v18  ;;  %v1008_v20 = vld [vmem:[#allocation18] sm:$0xf]  ;;  %v937_v21 = vrot.slane %v936_v19, 4  ;;  %v952_v22 = vld [vmem:[%s944_s29] sm:$0xf] }
 0x3b8   : > { %1011 = vst [vmem:[%s2083_s30] sm:$0xf] %v1008_v20  ;;  %v956_v23 = vsel %vm955_vm11, %v952_v22, 0.0  ;;  %s920_s21 = sand.u32 7, %s1756_s12   ;;  %s2084_s11 = scalar_lea.vmem [#allocation9], %s1795_s18 }
 0x3b9   : > { %v938_v24 = vadd.f32 %v937_v21, %v936_v19  ;;  %v957_v25 = vrot.slane %v956_v23, 4  ;;  %s921_s25 = scalar_lea.vmem [#allocation8], %s920_s21  ;;  %s923_s26 = scalar_lea.vmem [#allocation10], %s920_s21 }
 0x3ba   : > { %s925_s25 = smov %s921_s25  ;;  %s945_s26 = smov %s923_s26 }
 0x3bb   : > { %v939_v26 = vrot.slane %v938_v24, 2  ;;  %v958_v6 = vadd.f32 %v957_v25, %v956_v23  ;;  %s2085_s22 = scalar_lea.vmem [#allocation11], %s1795_s18  ;;  %s1039_s14 = sshrl.u32 (%p1770_p3), %s1756_s12, 3 }
 0x3bc   : > { %s2086_s20 = scalar_lea.vmem (%p1770_p3), [#allocation9], %s1795_s18  ;;  %s1580_s15 = sshll.u32 (%p1770_p3), %s1039_s14, 2 }
 0x3bd   : > { %v940_v7 = vadd.f32 %v939_v26, %v938_v24  ;;  %v959_v27 = vrot.slane %v958_v6, 2  ;;  %s1041_s17 = scalar_lea.vmem (%p1770_p3), %s2071_s4, %s1580_s15 }
 0x3bf   : > { %v941_v28 = vrot.slane %v940_v7, 1  ;;  %v960_v29 = vadd.f32 %v959_v27, %v958_v6 }
 0x3c1   : > { %v942_v30 = vadd.f32 %v941_v28, %v940_v7  ;;  %v961_v31 = vrot.slane %v960_v29, 1 }
 0x3c3   : > { %943 = vst [vmem:[%s925_s25] sm:$0x1] %v942_v30  ;;  %v962_v32 = vadd.f32 %v961_v31, %v960_v29 }
 0x3c5   : > { %963 = vst [vmem:[%s945_s26] sm:$0x1] %v962_v32 }
 0x3c9   : > { %1038 = sbr.rel (!%p1770_p3) target bundleno = 980 (0x3d4), region = 158 }
 0x3ca   : > { %v968_v33 = vld [vmem:[#allocation8] sm:$0xf] }
 0x3cb   : > { %971 = vst [vmem:[%s2084_s11] sm:$0xf] %v968_v33 }
 0x3cc   : > { %v976_v34 = vld [vmem:[#allocation10] sm:$0xf] }
 0x3cd   : > { %979 = vst [vmem:[%s2085_s22] sm:$0xf] %v976_v34 }
 0x3d2   : > { %v1058_v35 = vld [vmem:[%s2086_s20] sm:$0xf] }
 0x3d3   : > { %1059 = vst [vmem:[%s1041_s17] sm:$0xf] %v1058_v35 }
 0x3d4 PF: > { %1077 = sbr.rel (!%p1770_p3) target bundleno = 988 (0x3dc), region = 192  ;;  %s1078_s27 = sshrl.u32 (%p1770_p3), %s1756_s12, 3 }
 0x3d5   : > { %s2087_s29 = scalar_lea.vmem (%p1770_p3), [#allocation11], %s1795_s18  ;;  %s1581_s16 = sshll.u32 (%p1770_p3), %s1078_s27, 2 }
 0x3d6   : > { %s1080_s25 = scalar_lea.vmem (%p1770_p3), %s2072_s5, %s1581_s16 }
 0x3da   : > { %v1097_v36 = vld [vmem:[%s2087_s29] sm:$0xf] }
 0x3db   : > { %1098 = vst [vmem:[%s1080_s25] sm:$0xf] %v1097_v36 }
 0x3dc PF: > { %s1582_s26 = sshll.u32 %s1756_s12, 2  ;;  %s2088_s19 = scalar_lea.vmem [#allocation13], %s1793_s28 }
 0x3dd   : > { %v1132_v37 = vld [vmem:[%s2088_s19] sm:$0xf]  ;;  %s2089_s11 = scalar_lea.vmem [#allocation15], %s1793_s28  ;;  %s1115_s14 = scalar_lea.vmem %s2073_s6, %s1582_s26 }
 0x3de   : > { %v1167_v38 = vld [vmem:[%s2089_s11] sm:$0xf]  ;;  %s1150_s24 = scalar_lea.vmem %s2074_s7, %s1582_s26  ;;  %s2090_s23 = scalar_lea.vmem [#allocation17], %s1793_s28  ;;  %1133 = vst [vmem:[%s1115_s14] sm:$0xf] %v1132_v37 }
 0x3df   : > { %v1202_v39 = vld [vmem:[%s2090_s23] sm:$0xf]  ;;  %s2091_s17 = scalar_lea.vmem [#allocation19], %s1793_s28  ;;  %1168 = vst [vmem:[%s1150_s24] sm:$0xf] %v1167_v38  ;;  %s1185_s29 = scalar_lea.vmem %s2075_s8, %s1582_s26 }
 0x3e0   : > { %v1237_v40 = vld [vmem:[%s2091_s17] sm:$0xf]  ;;  %s1220_s21 = scalar_lea.vmem %s2076_s9, %s1582_s26  ;;  %1203 = vst [vmem:[%s1185_s29] sm:$0xf] %v1202_v39 }
 0x3e1   : > { %1238 = vst [vmem:[%s1220_s21] sm:$0xf] %v1237_v40 }
 0x3e2 PF: > { %s2092_s25 = sld [smem:[#allocation33_spill]]  ;;  %p13_p13 = scmp.ge.s32.totalorder %s1759_s13, 6  }
 0x3e3   : > { %s2093_s30 = smov %s1673_s10  ;;  %s2095_s11 = smov %s1759_s13 }
 0x3e4   :  { %15 = sbr.rel (!%p13_p13) target bundleno = 2 (0x2), region = 484 }
 0x3e8   : > { %s2094_s10 = smov %s2092_s25 }

// kernel: spodnet_forward.1
= control target key start
LH: loop header
LB: loop body
LE: loop exit
PB: predicated region body
PF: predicated region fallthrough
CT: control target
= control target key end

     0   :  { %s3242_s15 = smov 0   ;;  %s3244_s16 = smov 0   ;;  %s3736_s0 = inlined_call_operand.vmem [shape: f32[2,8,2,8], index: 0, kind: input, shape index: {}, may-alias: {0,14}]   ;;  %s3737_s1 = inlined_call_operand.vmem [shape: f32[2,8,2,8], index: 1, kind: input, shape index: {}]   ;;  %s3738_s2 = inlined_call_operand.vmem [shape: f32[8,8,8], index: 2, kind: input, shape index: {}]   ;;  %s3739_s3 = inlined_call_operand.vmem [shape: f32[1,8], index: 3, kind: input, shape index: {}]   ;;  %s3740_s4 = inlined_call_operand.vmem [shape: f32[8,8], index: 4, kind: input, shape index: {}]   ;;  %s3741_s5 = inlined_call_operand.vmem [shape: f32[1,8], index: 5, kind: input, shape index: {}]   ;;  %s3742_s6 = inlined_call_operand.vmem [shape: f32[8,8,8], index: 6, kind: input, shape index: {}]   ;;  %s3743_s7 = inlined_call_operand.vmem [shape: f32[8,1,8], index: 7, kind: input, shape index: {}]   ;;  %s3744_s8 = inlined_call_operand.vmem [shape: f32[1,3], index: 8, kind: input, shape index: {}]   ;;  %s3745_s9 = inlined_call_operand.vmem [shape: f32[1,3], index: 9, kind: input, shape index: {}]   ;;  %s3746_s10 = inlined_call_operand.vmem [shape: f32[3,3], index: 10, kind: input, shape index: {}]   ;;  %s3747_s11 = inlined_call_operand.vmem [shape: f32[1,3], index: 11, kind: input, shape index: {}]   ;;  %s3748_s12 = inlined_call_operand.vmem [shape: f32[1,3], index: 12, kind: input, shape index: {}]   ;;  %s3749_s13 = inlined_call_operand.<no memory space> [shape: f32[1,1], index: 13, kind: input, shape index: {}]   ;;  %s3750_s14 = inlined_call_operand.vmem [shape: f32[2,8,2,8], index: 14, kind: output, shape index: {}, may-alias: {0,14}]  }
   0x1   :  { %3756 = sst [smem:[#allocation13_spill]] %s3736_s0  ;;  %v19_v0 = vstv %s3749_s13  ;;  %s3246_s17 = smov 0  }
   0x2   :  { %3757 = sst [smem:[#allocation14_spill]] %s3748_s12  ;;  %20 = vst [vmem:[#allocation4] sm:$0x1] %v19_v0  ;;  %s3248_s18 = smov 0  }
   0x3   :  { %s3250_s19 = smov 0   ;;  %s3252_s20 = smov 0  }
   0x4   :  { %s3254_s21 = smov 0  }
   0x5 LB: > { %3758 = sst [smem:[#allocation5_spill]] %s3139_s16  ;;  %s38_s13 = sadd.s32 1, %s3147_s18  ;;  %s3159_s21 = sphi %s3254_s21, %s26_s21   ;;  %s3155_s20 = sphi %s3252_s20, %s3778_s20   ;;  %s3151_s19 = sphi %s3250_s19, %s3777_s19   ;;  %s3147_s18 = sphi %s3248_s18, %s3776_s18   ;;  %s3143_s17 = sphi %s3246_s17, %s3775_s17   ;;  %s3139_s16 = sphi %s3244_s16, %s3774_s16   ;;  %s3135_s15 = sphi %s3242_s15, %s3773_s15  }
   0x6   : > { %3759 = sst [smem:[#allocation6_spill]] %s3147_s18  ;;  %p39_p0 = scmp.ge.s32.totalorder %s38_s13, 8 }
   0x7   : > { %3760 = sst [smem:[#allocation7_spill]] %s3151_s19  ;;  %s41_s22 = sadd.s32 1, %s3151_s19 }
   0x8   : > { %3761 = sst [smem:[#allocation8_spill]] %s3155_s20  ;;  %p2888_p1 = scmp.ge.s32.totalorder %s3159_s21, 1 }
   0x9   : > { %3762 = sst [smem:[#allocation9_spill]] %s3159_s21  ;;  %p469_p2 = scmp.lt.s32.totalorder %s3159_s21, 33 }
   0xa   : > { %s3780_s13 = smov (%p39_p0, %s38_s13), 0  ;;  %s3782_s22 = smov (!%p39_p0, %s41_s22), %s3151_s19 }
   0xb   : > { %3763 = sst [smem:[#allocation10_spill]] %s3780_s13  ;;  %p470_p3 = pnand %p2888_p1, %p469_p2 }
   0xc   : > { %p43_p4 = scmp.ge.s32.totalorder %s3782_s22, 2  ;;  %s45_s23 = sadd.s32 1, %s3155_s20 }
   0xd   : > { %p531_p6 = scmp.lt.s32.totalorder (!%p470_p3), %s3143_s17, 1  ;;  %p541_p7 = scmp.lt.s32.totalorder (!%p470_p3), %s3135_s15, 7 }
   0xe   : > { %s3784_s22 = smov (%p43_p4, %s3782_s22), 0  ;;  %s3786_s23 = smov (!%p43_p4, %s45_s23), %s3155_s20 }
   0xf   : > { %3764 = sst [smem:[#allocation11_spill]] %s3784_s22  ;;  %p47_p5 = scmp.ge.s32.totalorder %s3786_s23, 2 }
  0x10   : > { %473 = sbr.rel (%p470_p3) target bundleno = 1584 (0x630), region = 76  ;;  %p557_p8 = scmp.eq.s32.totalorder (!%p470_p3), %s3139_s16, 0 }
  0x11   : > { %s3788_s23 = smov (%p47_p5, %s3786_s23), 0  ;;  %p558_p9 = scmp.eq.s32.totalorder (!%p470_p3), %s3135_s15, 0 }
  0x12   : > { %3765 = sst [smem:[#allocation12_spill]] %s3788_s23 }
  0x13   : > { %p559_p10 = pnand (!%p470_p3), %p558_p9, %p557_p8  ;;  %s3766_s0 = sld [smem:[#allocation13_spill]] (!%p470_p3) }
  0x15   : > { %s3790_s17 = smov (!%p531_p6, %s3143_s17), 1 }
  0x16   : > { %s3292_s24 = scalar_select %p541_p7, %s3135_s15, 7 }
  0x17   : > { %s2909_s25 = sshll.u32 %s3790_s17, 4  ;;  %562 = sbr.rel (%p559_p10) target bundleno = 40 (0x28), region = 80 }
  0x18   : > { %s3300_s23 = scalar_lea.vmem %s3737_s1, %s2909_s25  ;;  %s2893_s22 = sshll.u32 %s3292_s24, 3 }
  0x19   : > { %s535_s28 = scalar_lea.vmem %s3766_s0, %s2909_s25  ;;  %s551_s19 = scalar_lea.vmem %s3743_s7, %s3292_s24 }
  0x1a   : > { %s3310_s16 = scalar_lea.vmem %s3738_s2, %s2893_s22  ;;  %s3315_s26 = scalar_lea.vmem %s3742_s6, %s2893_s22 }
  0x1b   : > { %s3320_s29 = scalar_lea.vmem %s3750_s14, %s2909_s25 }
  0x1c   : > { %v563_v1 = vld [vmem:[%s535_s28] sm:$0x3]  ;;  %vm571_vm0 = vcmask 58368   ;;  %v564_v2 = vld [vmem:[%s535_s28 + $0x2] sm:$0x3] }
  0x1d   : > { %572 = vst.msk [vmem:[#allocation2] sm:$0x3] %vm571_vm0, %v563_v1  ;;  %573 = vst.msk [vmem:[#allocation2 + $0x2] sm:$0x3] %vm571_vm0, %v564_v2  ;;  %v565_v3 = vld [vmem:[%s535_s28 + $0x4] sm:$0x3] }
  0x1e   : > { %v566_v4 = vld [vmem:[%s535_s28 + $0x6] sm:$0x3]  ;;  %v567_v5 = vld [vmem:[%s535_s28 + $0x8] sm:$0x3]  ;;  %574 = vst.msk [vmem:[#allocation2 + $0x4] sm:$0x3] %vm571_vm0, %v565_v3 }
  0x1f   : > { %575 = vst.msk [vmem:[#allocation2 + $0x6] sm:$0x3] %vm571_vm0, %v566_v4  ;;  %576 = vst.msk [vmem:[#allocation2 + $0x8] sm:$0x3] %vm571_vm0, %v567_v5  ;;  %v568_v6 = vld [vmem:[%s535_s28 + $0xa] sm:$0x3] }
  0x20   : > { %v569_v7 = vld [vmem:[%s535_s28 + $0xc] sm:$0x3]  ;;  %v570_v8 = vld [vmem:[%s535_s28 + $0xe] sm:$0x3]  ;;  %577 = vst.msk [vmem:[#allocation2 + $0xa] sm:$0x3] %vm571_vm0, %v568_v6 }
  0x21   : > { %578 = vst.msk [vmem:[#allocation2 + $0xc] sm:$0x3] %vm571_vm0, %v569_v7  ;;  %579 = vst.msk [vmem:[#allocation2 + $0xe] sm:$0x3] %vm571_vm0, %v570_v8  ;;  %v580_v9 = vld [vmem:[%s3300_s23] sm:$0x3] }
  0x22   : > { %v581_v10 = vld [vmem:[%s3300_s23 + $0x2] sm:$0x3]  ;;  %v582_v11 = vld [vmem:[%s3300_s23 + $0x4] sm:$0x3]  ;;  %588 = vst.msk [vmem:[#allocation3] sm:$0x3] %vm571_vm0, %v580_v9 }
  0x23   : > { %589 = vst.msk [vmem:[#allocation3 + $0x2] sm:$0x3] %vm571_vm0, %v581_v10  ;;  %590 = vst.msk [vmem:[#allocation3 + $0x4] sm:$0x3] %vm571_vm0, %v582_v11  ;;  %v583_v12 = vld [vmem:[%s3300_s23 + $0x6] sm:$0x3] }
  0x24   : > { %v584_v13 = vld [vmem:[%s3300_s23 + $0x8] sm:$0x3]  ;;  %v585_v14 = vld [vmem:[%s3300_s23 + $0xa] sm:$0x3]  ;;  %591 = vst.msk [vmem:[#allocation3 + $0x6] sm:$0x3] %vm571_vm0, %v583_v12 }
  0x25   : > { %592 = vst.msk [vmem:[#allocation3 + $0x8] sm:$0x3] %vm571_vm0, %v584_v13  ;;  %593 = vst.msk [vmem:[#allocation3 + $0xa] sm:$0x3] %vm571_vm0, %v585_v14  ;;  %v586_v15 = vld [vmem:[%s3300_s23 + $0xc] sm:$0x3] }
  0x26   : > { %v587_v16 = vld [vmem:[%s3300_s23 + $0xe] sm:$0x3]  ;;  %594 = vst.msk [vmem:[#allocation3 + $0xc] sm:$0x3] %vm571_vm0, %v586_v15 }
  0x27   : > { %595 = vst.msk [vmem:[#allocation3 + $0xe] sm:$0x3] %vm571_vm0, %v587_v16 }
  0x28 PF: > { %v620_v17 = vld [vmem:[%s3310_s16] sm:$0xff]  ;;  %v596_v18 = vlaneseq  ;;  %s2898_s0 = sshll.u32 %s3135_s15, 1  ;;  %v3161_v19 = vmov 0.0   ;;  %v598_v21 = vstv %s3135_s15  ;;  %vm3162_vm1 = vmmov 0   ;;  %s3769_s21 = sld [smem:[#allocation14_spill]] }
  0x29   : > { %2948 = vmatprep.subr.mxu0 %v3161_v19  ;;  %v663_v20 = vand.u32 4294901760, %v620_v17  ;;  %2953 = vmatprep.subr.mxu1 %v3161_v19  ;;  %s3371_s12 = scalar_lea.vmem [#allocation2], %s2898_s0  ;;  %vm628_vm3 = vcmask 64512   ;;  %v1079_v38 = vld [vmem:[%s3740_s4] sm:$0xff]  ;;  %vm609_vm4 = vcmask 58368   ;;  %s3510_s17 = scalar_lea.vmem [#allocation3], %s2898_s0 }
  0x2a   : > { %2950 = vmatprep.mubr.msk.f32.mxu0 %vm3162_vm1, %v3161_v19  ;;  %2955 = vmatprep.mubr.msk.f32.mxu1 %vm3162_vm1, %v3161_v19  ;;  %v3356_v22 = vand.u32 127, %v596_v18  ;;  %v3374_v27 = vld [vmem:[%s3371_s12] sm:$0x3]  ;;  %v1121_v39 = vand.u32 4294901760, %v1079_v38  ;;  %vm2066_vm5 = vcmask 1041409   ;;  %vm2168_vm6 = vcmask 1042434  }
  0x2b   : > { %2949 = vmatpush3.msra.mxu0 %v663_v20  ;;  %v740_v23 = vsub.f32 %v620_v17, %v663_v20  ;;  %v2899_v47 = vld [vmem:[%s3739_s3] ss:$0 sm:$0xff]  ;;  %vm2170_vm7 = vcmask 1043459   ;;  %vm2172_vm8 = vcmask 1044484   ;;  %vm2174_vm9 = vcmask 1045509   ;;  %s3770_s13 = sld [smem:[#allocation5_spill]] }
  0x2c   : > { %2958 = vmatprep.subr.mxu0 %v3161_v19  ;;  %vm3360_vm2 = vcmp.eq.s32.totalorder %v3356_v22, %v598_v21  ;;  %v1198_v40 = vsub.f32 %v1079_v38, %v1121_v39  ;;  %v1537_v6 = vld [vmem:[%s3315_s26] sm:$0xff]  ;;  %vm2176_vm10 = vcmask 1046534   ;;  %vm2178_vm11 = vcmask 1047559   ;;  %p2742_p12 = scmp.eq.s32.totalorder %s3135_s15, 7 }
  0x2d   : > { %v741_v25 = vand.u32 4294901760, %v740_v23  ;;  %v3367_v26 = vsel %vm3360_vm2, 1.0, %v3161_v19  ;;  %v1579_v7 = vand.u32 4294901760, %v1537_v6  ;;  %vm2028_vm12 = vcmask 18432  }
  0x2e   : > { %v3377_v28 = vsub.f32 1.0, %v3367_v26  ;;  %v1199_v41 = vand.u32 4294901760, %v1198_v40  ;;  %v608_v12 = vmul.f32 %v3367_v26, %v3374_v27  ;;  %vm2069_vm13 = vcmask 17408  }
  0x2f   : > { %v742_v29 = vsub.f32 %v740_v23, %v741_v25  ;;  %v1656_v8 = vsub.f32 %v1537_v6, %v1579_v7 }
  0x30   : > { %v617_v30 = vmul.f32 %v3374_v27, %v3377_v28  ;;  %v1200_v42 = vsub.f32 %v1198_v40, %v1199_v41  ;;  %v610_v13 = vsel %vm609_vm4, %v608_v12, 0.0 }
  0x31   : > { %v743_v31 = vand.u32 4294901760, %v742_v29  ;;  %v1657_v9 = vand.u32 4294901760, %v1656_v8  ;;  %611 = vadd.xlane.f32.xlu0 %v610_v13  ;;  %p2741_p11 = scmp.eq.s32.totalorder %s3770_s13, 1 }
  0x32   : > { %v630_v32 = vsel %vm628_vm3, %v617_v30, 0  ;;  %v1201_v43 = vand.u32 4294901760, %v1200_v42 }
  0x33   : > { %2954 = vmatpush3.msra.mxu1 %v743_v31  ;;  %v698_v33 = vand.u32 4294901760, %v630_v32  ;;  %v1658_v10 = vsub.f32 %v1656_v8, %v1657_v9  ;;  %p3608_p13 = pnand %p2742_p12, %p2741_p11 }
  0x34   : > { %2963 = vmatprep.subr.mxu1 %v3161_v19 }
  0x35   : > { %v699_v34 = vsub.f32 %v630_v32, %v698_v33  ;;  %2956 = vmatmul.mubr.f32.vlgmr.msra.gmra.mxu1 %v698_v33  ;;  %v1659_v11 = vand.u32 4294901760, %v1658_v10  ;;  %v3469_v10 = vld [vmem:[#allocation3 + $0x8] sm:$0x3] }
  0x36   : > { %2964 = vmatpush3.msra.mxu1 %v663_v20  ;;  %2965 = vmatprep.mubr.msk.f32.mxu1 %vm3162_vm1, %v3161_v19 }
  0x37   : > { %v700_v35 = vand.u32 4294901760, %v699_v34  ;;  %2973 = vmatprep.subr.mxu1 %v3161_v19 }
  0x39   : > { %v701_v36 = vsub.f32 %v699_v34, %v700_v35  ;;  %2966 = vmatmul.mubr.f32.vlgmr.msra.gmra.mxu1 %v700_v35 }
  0x3a   : > { %2974 = vmatpush3.msra.mxu1 %v663_v20  ;;  %2975 = vmatprep.mubr.msk.f32.mxu1 %vm3162_vm1, %v3161_v19  ;;  %v2900_v20 = vld [vmem:[%s3741_s5] ss:$0 sm:$0xff] }
  0x3b   : > { %v702_v37 = vand.u32 4294901760, %v701_v36  ;;  %2983 = vmatprep.subr.mxu1 %v3161_v19 }
  0x3d   : > { %2951 = vmatmul.mubr.f32.vlgmr.msra.gmra.mxu0 %v702_v37  ;;  %2976 = vmatmul.mubr.f32.vlgmr.msra.gmra.mxu1 %v698_v33 }
  0x3e   : > { %2959 = vmatpush3.msra.mxu0 %v740_v23  ;;  %2960 = vmatprep.mubr.msk.f32.mxu0 %vm3162_vm1, %v3161_v19 }
  0x3f   : > { %2968 = vmatprep.subr.mxu0 %v3161_v19  ;;  %2985 = vmatprep.mubr.msk.f32.mxu1 %vm3162_vm1, %v3161_v19 }
  0x40   : > { %2984 = vmatpush3.msra.mxu1 %v1201_v43 }
  0x41   : > { %2961 = vmatmul.mubr.f32.vlgmr.msra.gmra.mxu0 %v699_v34  ;;  %2993 = vmatprep.subr.mxu1 %v3161_v19 }
  0x42   : > { %2969 = vmatpush3.msra.mxu0 %v741_v25  ;;  %2970 = vmatprep.mubr.msk.f32.mxu0 %vm3162_vm1, %v3161_v19 }
  0x43   : > { %2978 = vmatprep.subr.mxu0 %v3161_v19 }
  0x45   : > { %2971 = vmatmul.mubr.f32.vlgmr.msra.gmra.mxu0 %v698_v33 }
  0x46   : > { %2980 = vmatprep.mubr.msk.f32.mxu0 %vm3162_vm1, %v3161_v19  ;;  %2979 = vmatpush3.msra.mxu0 %v1121_v39 }
  0x47   : > { %2988 = vmatprep.subr.mxu0 %v3161_v19 }
  0xf5   : > { %v780_v44 = vpop.f32.mrf.mxu1 }
  0xf7   : > { %v2957_v45 = vpop.f32.mrf.mxu1 }
  0xf9   : > { %v928_v46 = vpop.f32.mrf.mxu1 }
  0xfb   : > { %v2967_v48 = vpop.f32.mrf.mxu1 }
  0xfd   : > { %v704_v49 = vpop.f32.mrf.mxu0  ;;  %v1074_v50 = vpop.f32.mrf.mxu1 }
  0xfe   : > { %v705_v51 = vadd.f32 %v2899_v47, %v704_v49 }
  0xff   : > { %v2952_v52 = vpop.f32.mrf.mxu0  ;;  %v2977_v53 = vpop.f32.mrf.mxu1 }
 0x100   : > { %v781_v54 = vadd.f32 %v780_v44, %v705_v51 }
 0x101   : > { %v854_v55 = vpop.f32.mrf.mxu0 }
 0x102   : > { %v855_v56 = vadd.f32 %v854_v55, %v781_v54 }
 0x103   : > { %v2962_v57 = vpop.f32.mrf.mxu0 }
 0x104   : > { %v929_v58 = vadd.f32 %v928_v46, %v855_v56 }
 0x105   : > { %v1002_v59 = vpop.f32.mrf.mxu0 }
 0x106   : > { %v1003_v60 = vadd.f32 %v1002_v59, %v929_v58 }
 0x107   : > { %v2972_v61 = vpop.f32.mrf.mxu0 }
 0x108   : > { %v1075_v62 = vadd.f32 %v1074_v50, %v1003_v60  ;;  %v2901_v50 = vld [vmem:[%s551_s19] ss:$0 sm:$0xff] }
 0x10a   : > { %v1078_v63 = vmax.f32 %v1075_v62, 0.0 }
 0x10c   : > { %v1088_v0 = vsel %vm628_vm3, %v1078_v63, 0  ;;  %v3449_v63 = vld [vmem:[#allocation3 + $0x2] sm:$0x3] }
 0x10d   : > { %v1156_v1 = vand.u32 4294901760, %v1088_v0 }
 0x10f   : > { %v1157_v2 = vsub.f32 %v1088_v0, %v1156_v1  ;;  %2986 = vmatmul.mubr.f32.vlgmr.msra.gmra.mxu1 %v1156_v1  ;;  %v3451_v0 = vld [vmem:[#allocation3] sm:$0x3] }
 0x110   : > { %2994 = vmatpush3.msra.mxu1 %v1121_v39  ;;  %2995 = vmatprep.mubr.msk.f32.mxu1 %vm3162_vm1, %v3161_v19 }
 0x111   : > { %v1158_v3 = vand.u32 4294901760, %v1157_v2  ;;  %3003 = vmatprep.subr.mxu1 %v3161_v19 }
 0x113   : > { %2996 = vmatmul.mubr.f32.vlgmr.msra.gmra.mxu1 %v1158_v3  ;;  %v1159_v4 = vsub.f32 %v1157_v2, %v1158_v3  ;;  %v3457_v3 = vld [vmem:[#allocation3 + $0x6] sm:$0x3] }
 0x114   : > { %3004 = vmatpush3.msra.mxu1 %v1121_v39  ;;  %3005 = vmatprep.mubr.msk.f32.mxu1 %vm3162_vm1, %v3161_v19 }
 0x115   : > { %v1160_v5 = vand.u32 4294901760, %v1159_v4  ;;  %3013 = vmatprep.subr.mxu1 %v3161_v19 }
 0x117   : > { %2981 = vmatmul.mubr.f32.vlgmr.msra.gmra.mxu0 %v1160_v5  ;;  %3006 = vmatmul.mubr.f32.vlgmr.msra.gmra.mxu1 %v1156_v1 }
 0x118   : > { %2989 = vmatpush3.msra.mxu0 %v1198_v40  ;;  %2990 = vmatprep.mubr.msk.f32.mxu0 %vm3162_vm1, %v3161_v19 }
 0x119   : > { %2998 = vmatprep.subr.mxu0 %v3161_v19  ;;  %3015 = vmatprep.mubr.msk.f32.mxu1 %vm3162_vm1, %v3161_v19 }
 0x11a   : > { %3014 = vmatpush3.msra.mxu1 %v1659_v11  ;;  %v3471_v11 = vld [vmem:[#allocation3 + $0xa] sm:$0x3] }
 0x11b   : > { %2991 = vmatmul.mubr.f32.vlgmr.msra.gmra.mxu0 %v1157_v2  ;;  %3023 = vmatprep.subr.mxu1 %v3161_v19  ;;  %v3455_v2 = vld [vmem:[#allocation3 + $0x4] sm:$0x3] }
 0x11c   : > { %2999 = vmatpush3.msra.mxu0 %v1199_v41  ;;  %3000 = vmatprep.mubr.msk.f32.mxu0 %vm3162_vm1, %v3161_v19 }
 0x11d   : > { %3008 = vmatprep.subr.mxu0 %v3161_v19 }
 0x11f   : > { %3001 = vmatmul.mubr.f32.vlgmr.msra.gmra.mxu0 %v1156_v1 }
 0x120   : > { %3010 = vmatprep.mubr.msk.f32.mxu0 %vm3162_vm1, %v3161_v19  ;;  %3009 = vmatpush3.msra.mxu0 %v1579_v7 }
 0x121   : > { %3018 = vmatprep.subr.mxu0 %v3161_v19 }
 0x1cf   : > { %v1238_v14 = vpop.f32.mrf.mxu1 }
 0x1d1   : > { %v2987_v15 = vpop.f32.mrf.mxu1 }
 0x1d3   : > { %v1386_v16 = vpop.f32.mrf.mxu1 }
 0x1d5   : > { %v2997_v17 = vpop.f32.mrf.mxu1 }
 0x1d6   : > { %v3481_v17 = vld [vmem:[#allocation3 + $0xe] sm:$0x3] }
 0x1d7   : > { %v1162_v21 = vpop.f32.mrf.mxu0  ;;  %v1532_v23 = vpop.f32.mrf.mxu1 }
 0x1d8   : > { %v1163_v25 = vadd.f32 %v2900_v20, %v1162_v21 }
 0x1d9   : > { %v2982_v29 = vpop.f32.mrf.mxu0  ;;  %v3007_v30 = vpop.f32.mrf.mxu1 }
 0x1da   : > { %v1239_v31 = vadd.f32 %v1238_v14, %v1163_v25  ;;  %v2902_v29 = vld [vmem:[%s3744_s8] ss:$0 sm:$0xff]  ;;  %v612_v30 = vpop.xlane.xlu0 %611 }
 0x1db   : > { %v1312_v32 = vpop.f32.mrf.mxu0 }
 0x1dc   : > { %v1313_v27 = vadd.f32 %v1312_v32, %v1239_v31 }
 0x1dd   : > { %v2992_v33 = vpop.f32.mrf.mxu0 }
 0x1de   : > { %v1387_v34 = vadd.f32 %v1386_v16, %v1313_v27  ;;  %v3479_v16 = vld [vmem:[#allocation3 + $0xc] sm:$0x3]  ;;  %v2001_v27 = vmul.f32 %v2902_v29, %v612_v30  ;;  %v2903_v33 = vld [vmem:[%s3745_s9] ss:$0 sm:$0xff] }
 0x1df   : > { %v1460_v35 = vpop.f32.mrf.mxu0 }
 0x1e0   : > { %v1461_v36 = vadd.f32 %v1460_v35, %v1387_v34  ;;  %v2009_v34 = vadd.f32 %v2903_v33, %v2001_v27  ;;  %v3498_v35 = vshrl.u32 %v596_v18, 7 }
 0x1e1   : > { %v3002_v37 = vpop.f32.mrf.mxu0 }
 0x1e2   : > { %v1533_v38 = vadd.f32 %v1532_v23, %v1461_v36  ;;  %v2010_v36 = vmax.f32 %v2009_v34, 0.0  ;;  %v3501_v37 = vsub.s32 1, %v3498_v35 }
 0x1e4   : > { %v1536_v39 = vmax.f32 %v1533_v38, 0.0  ;;  %v2021_v38 = vrot.slane %v2010_v36, %v3501_v37 }
 0x1e6   : > { %v1546_v40 = vsel %vm628_vm3, %v1536_v39, 0  ;;  %v3505_v39 = vsub.s32 0, %v3498_v35 }
 0x1e7   : > { %v1614_v41 = vand.u32 4294901760, %v1546_v40 }
 0x1e9   : > { %v1615_v42 = vsub.f32 %v1546_v40, %v1614_v41  ;;  %3016 = vmatmul.mubr.f32.vlgmr.msra.gmra.mxu1 %v1614_v41  ;;  %v2014_v40 = vrot.slane %v2010_v36, %v3505_v39 }
 0x1ea   : > { %3024 = vmatpush3.msra.mxu1 %v1579_v7  ;;  %3025 = vmatprep.mubr.msk.f32.mxu1 %vm3162_vm1, %v3161_v19 }
 0x1eb   : > { %v1616_v43 = vand.u32 4294901760, %v1615_v42  ;;  %3033 = vmatprep.subr.mxu1 %v3161_v19 }
 0x1ed   : > { %3026 = vmatmul.mubr.f32.vlgmr.msra.gmra.mxu1 %v1616_v43  ;;  %v1617_v44 = vsub.f32 %v1615_v42, %v1616_v43 }
 0x1ee   : > { %3034 = vmatpush3.msra.mxu1 %v1579_v7  ;;  %3035 = vmatprep.mubr.msk.f32.mxu1 %vm3162_vm1, %v3161_v19 }
 0x1ef   : > { %v1618_v45 = vand.u32 4294901760, %v1617_v44 }
 0x1f1   : > { %3011 = vmatmul.mubr.f32.vlgmr.msra.gmra.mxu0 %v1618_v45  ;;  %3036 = vmatmul.mubr.f32.vlgmr.msra.gmra.mxu1 %v1614_v41 }
 0x1f2   : > { %3019 = vmatpush3.msra.mxu0 %v1656_v8  ;;  %3020 = vmatprep.mubr.msk.f32.mxu0 %vm3162_vm1, %v3161_v19 }
 0x1f3   : > { %3028 = vmatprep.subr.mxu0 %v3161_v19 }
 0x1f5   : > { %3021 = vmatmul.mubr.f32.vlgmr.msra.gmra.mxu0 %v1615_v42 }
 0x1f6   : > { %3029 = vmatpush3.msra.mxu0 %v1657_v9  ;;  %3030 = vmatprep.mubr.msk.f32.mxu0 %vm3162_vm1, %v3161_v19 }
 0x1f9   : > { %3031 = vmatmul.mubr.f32.vlgmr.msra.gmra.mxu0 %v1614_v41  ;;  %v607_v41 = vld [vmem:[%s3510_s17] sm:$0x3] }
 0x1fa   : > { %v3514_v18 = vmul.f32 %v607_v41, %v3377_v28  ;;  %v613_v42 = vmul.f32 %v3367_v26, %v607_v41 }
 0x1fc   : > { %v614_v44 = vsel %vm609_vm4, %v613_v42, 0.0 }
 0x2a9   : > { %v1696_v46 = vpop.f32.mrf.mxu1 }
 0x2ab   : > { %v3017_v47 = vpop.f32.mrf.mxu1 }
 0x2ad   : > { %v1844_v48 = vpop.f32.mrf.mxu1 }
 0x2af   : > { %v3027_v49 = vpop.f32.mrf.mxu1 }
 0x2b1   : > { %v1620_v51 = vpop.f32.mrf.mxu0  ;;  %v1990_v52 = vpop.f32.mrf.mxu1 }
 0x2b2   : > { %v1621_v53 = vadd.f32 %v2901_v50, %v1620_v51 }
 0x2b3   : > { %v3012_v54 = vpop.f32.mrf.mxu0  ;;  %v3037_v55 = vpop.f32.mrf.mxu1 }
 0x2b4   : > { %v1697_v56 = vadd.f32 %v1696_v46, %v1621_v53  ;;  %v2137_v46 = vsub.s32 %v3356_v22, %v3498_v35 }
 0x2b5   : > { %v1770_v57 = vpop.f32.mrf.mxu0 }
 0x2b6   : > { %v1771_v58 = vadd.f32 %v1770_v57, %v1697_v56 }
 0x2b7   : > { %v3022_v59 = vpop.f32.mrf.mxu0 }
 0x2b8   : > { %v1845_v19 = vadd.f32 %v1844_v48, %v1771_v58 }
 0x2b9   : > { %v1918_v60 = vpop.f32.mrf.mxu0 }
 0x2ba   : > { %v1919_v61 = vadd.f32 %v1918_v60, %v1845_v19 }
 0x2bb   : > { %v3032_v62 = vpop.f32.mrf.mxu0 }
 0x2bc   : > { %v3453_v1 = vadd.f32 %v1990_v52, %v1919_v61 }
 0x2be   : > { %v2092_v4 = vmul.f32 %v3449_v63, %v3453_v1  ;;  %v2091_v5 = vmul.f32 %v3451_v0, %v3453_v1  ;;  %v2093_v8 = vmul.f32 %v3455_v2, %v3453_v1  ;;  %v2094_v9 = vmul.f32 %v3457_v3, %v3453_v1 }
 0x2bf   : > { %v2095_v14 = vmul.f32 %v3469_v10, %v3453_v1  ;;  %v2096_v15 = vmul.f32 %v3471_v11, %v3453_v1  ;;  %v2097_v23 = vmul.f32 %v3479_v16, %v3453_v1  ;;  %v2098_v25 = vmul.f32 %v3481_v17, %v3453_v1 }
 0x2c0   : > { %v2102_v6 = vsel %vm609_vm4, %v2092_v4, 0.0  ;;  %v2099_v7 = vsel %vm609_vm4, %v2091_v5, 0.0  ;;  %v2105_v12 = vsel %vm609_vm4, %v2093_v8, 0.0  ;;  %v2108_v13 = vsel %vm609_vm4, %v2094_v9, 0.0 }
 0x2c1   : > { %2103 = vadd.xlane.f32.xlu1 %v2102_v6  ;;  %2100 = vadd.xlane.f32.xlu0 %v2099_v7  ;;  %v2111_v20 = vsel %vm609_vm4, %v2095_v14, 0.0  ;;  %v2114_v21 = vsel %vm609_vm4, %v2096_v15, 0.0  ;;  %v2117_v31 = vsel %vm609_vm4, %v2097_v23, 0.0  ;;  %v2120_v32 = vsel %vm609_vm4, %v2098_v25, 0.0  ;;  %v2025_v7 = vld [vmem:[%s3746_s10] sm:$0x7] }
 0x2c2   : > { %v2123_v43 = vmul.f32 %v3453_v1, %v3514_v18 }
 0x2c4   : > { %v2124_v45 = vsel %vm609_vm4, %v2123_v43, 0.0 }
 0x2c5   : > { %2106 = vadd.xlane.f32.xlu1 %v2105_v12  ;;  %2109 = vadd.xlane.f32.xlu0 %v2108_v13 }
 0x2c9   : > { %2112 = vadd.xlane.f32.xlu1 %v2111_v20  ;;  %2115 = vadd.xlane.f32.xlu0 %v2114_v21 }
 0x2cd   : > { %2118 = vadd.xlane.f32.xlu1 %v2117_v31  ;;  %2121 = vadd.xlane.f32.xlu0 %v2120_v32 }
 0x2de   : > { %2023 = vbcast.lane.b32.xlu1 %v2021_v38, 256  ;;  %v2904_v38 = vld [vmem:[%s3747_s11] ss:$0 sm:$0xff] }
 0x2e3   : > { %2016 = vbcast.lane.b32.xlu0 %v2014_v40, 256 }
 0x302   : > { %615 = vadd.xlane.f32.xlu1 %v614_v44  ;;  %2125 = vadd.xlane.f32.xlu0 %v2124_v45  ;;  %v2905_v44 = vld [vmem:[%s3769_s21] ss:$0 sm:$0xff] }
 0x34a   : > { %v2104_v47 = vpop.xlane.xlu1 %2103  ;;  %v2101_v48 = vpop.xlane.xlu0 %2100 }
 0x34b   : > { %v2142_v49 = vrot.slane %v2104_v47, %v2137_v46  ;;  %v2138_v50 = vrot.slane %v2101_v48, %v2137_v46 }
 0x34d   : > { %v2167_v54 = vsel %vm2066_vm5, %v2142_v49, %v2138_v50 }
 0x34e   : > { %v2107_v51 = vpop.xlane.xlu1 %2106  ;;  %v2110_v52 = vpop.xlane.xlu0 %2109 }
 0x34f   : > { %v2146_v53 = vrot.slane %v2107_v51, %v2137_v46  ;;  %v2150_v55 = vrot.slane %v2110_v52, %v2137_v46 }
 0x351   : > { %v2169_v56 = vsel %vm2168_vm6, %v2146_v53, %v2167_v54 }
 0x352   : > { %v2113_v57 = vpop.xlane.xlu1 %2112  ;;  %v2116_v58 = vpop.xlane.xlu0 %2115  ;;  %v2171_v19 = vsel %vm2170_vm7, %v2150_v55, %v2169_v56 }
 0x353   : > { %v2154_v59 = vrot.slane %v2113_v57, %v2137_v46  ;;  %v2158_v22 = vrot.slane %v2116_v58, %v2137_v46 }
 0x355   : > { %v2173_v60 = vsel %vm2172_vm8, %v2154_v59, %v2171_v19 }
 0x356   : > { %v2119_v61 = vpop.xlane.xlu1 %2118  ;;  %v2122_v62 = vpop.xlane.xlu0 %2121  ;;  %v2175_v6 = vsel %vm2174_vm9, %v2158_v22, %v2173_v60  ;;  %v3163_v22 = vmov 0   ;;  %v2906_v60 = vld [vmem:[#allocation4] ss:$0 sm:$0xff] }
 0x357   : > { %v2162_v4 = vrot.slane %v2119_v61, %v2137_v46  ;;  %v2166_v5 = vrot.slane %v2122_v62, %v2137_v46 }
 0x359   : > { %v2177_v8 = vsel %vm2176_vm10, %v2162_v4, %v2175_v6 }
 0x35a   : > { %v2179_v9 = vsel %vm2178_vm11, %v2166_v5, %v2177_v8  ;;  %v2024_v12 = vpop.permute.xlu1 %2023  ;;  %v2017_v13 = vpop.permute.xlu0 %2016 }
 0x35b   : > { %2181 = vxpose.xlu1.b32.start.end [1/1] (short) (narrow) %v2179_v9, 8  ;;  %v2027_v14 = vmul.f32 %v2025_v7, %v2024_v12  ;;  %v2026_v15 = vmul.f32 %v2025_v7, %v2017_v13 }
 0x35d   : > { %v2036_v20 = vsel %vm2028_vm12, %v2027_v14, 0.0  ;;  %v2029_v21 = vsel %vm2028_vm12, %v2026_v15, 0.0 }
 0x35e   : > { %v2037_v23 = vrot.slane %v2036_v20, 4  ;;  %v2030_v25 = vrot.slane %v2029_v21, 4 }
 0x35f   : > { %2354 = vxpose.xlu1.b32.start.end [1/1] (short) (narrow) %v3514_v18, 8 }
 0x360   : > { %v2038_v29 = vadd.f32 %v2037_v23, %v2036_v20  ;;  %v2031_v30 = vadd.f32 %v2030_v25, %v2029_v21  ;;  %v3541_v20 = vsub.s32 7, %v3498_v35 }
 0x362   : > { %v2039_v31 = vrot.slane %v2038_v29, 2  ;;  %v2032_v32 = vrot.slane %v2031_v30, 2 }
 0x364   : > { %v2040_v27 = vadd.f32 %v2039_v31, %v2038_v29  ;;  %v2033_v33 = vadd.f32 %v2032_v32, %v2031_v30  ;;  %v3546_v29 = vsub.s32 2, %v3498_v35  ;;  %v3550_v31 = vsub.s32 3, %v3498_v35 }
 0x366   : > { %v2041_v34 = vrot.slane %v2040_v27, 1  ;;  %v2034_v36 = vrot.slane %v2033_v33, 1 }
 0x368   : > { %v2042_v40 = vadd.f32 %v2041_v34, %v2040_v27  ;;  %v2035_v41 = vadd.f32 %v2034_v36, %v2033_v33  ;;  %v3554_v27 = vsub.s32 4, %v3498_v35  ;;  %v3558_v34 = vsub.s32 5, %v3498_v35 }
 0x36a   : > { %v2050_v42 = vadd.f32 %v2904_v38, %v2035_v41  ;;  %v2051_v43 = vadd.f32 %v2904_v38, %v2042_v40  ;;  %v3562_v38 = vsub.s32 6, %v3498_v35 }
 0x36c   : > { %v2052_v45 = vmax.f32 %v2050_v42, 0.0  ;;  %v2053_v46 = vmax.f32 %v2051_v43, 0.0 }
 0x36e   : > { %v2061_v47 = vmul.f32 %v2905_v44, %v2052_v45  ;;  %v2062_v48 = vmul.f32 %v2905_v44, %v2053_v46 }
 0x370   : > { %v2065_v49 = vrot.slane %v2062_v48, 7 }
 0x372   : > { %v2067_v50 = vsel %vm2066_vm5, %v2065_v49, %v2061_v47 }
 0x373   : > { %v2070_v51 = vsel %vm2069_vm13, %v2067_v50, 0.0 }
 0x374   : > { %2071 = vadd.xlane.f32.xlu0 %v2070_v51 }
 0x37d   : > { %3097 = vset.pattern.permute.xlu1 %v3163_v22 }
 0x38b   : > { %v616_v52 = vpop.xlane.xlu1 %615  ;;  %v2126_v54 = vpop.xlane.xlu0 %2125 }
 0x38c   : > { %3099 = vrcp.f32 %v616_v52 }
 0x399   : > { %v3100_v53 = vpop.eup %3099 }
 0x39a   : > { %v2213_v55 = vmul.f32 %v3100_v53, %v2126_v54 }
 0x39c   : > { %v2214_v56 = vmul.f32 %v2213_v55, %v3514_v18 }
 0x3d7   : > { %v2197_v57 = vpop.trf.xlu1 }
 0x3d8   : > { %v2215_v58 = vsub.f32 %v2197_v57, %v2214_v56 }
 0x3da   : > { %v2216_v59 = vmul.f32 %v2215_v58, %v3453_v1 }
 0x3db   : > { %v2370_v12 = vpop.trf.xlu1 }
 0x3dc   : > { %v2217_v19 = vsel %vm609_vm4, %v2216_v59, 0.0 }
 0x3dd   : > { %2218 = vadd.xlane.f32.xlu0 %v2217_v19 }
 0x3fd   : > { %v2072_v61 = vpop.xlane.xlu0 %2071 }
 0x3fe   : > { %v2080_v62 = vadd.f32 %v2906_v60, %v2072_v61 }
 0x400   : > { %v2081_v4 = vmul.f32 1.442695, %v2080_v62 }
 0x402   : > { %3101 = vpow2.f32 %v2081_v4 }
 0x40a   : > { %2386 = vxpose.xlu0.b32.start.end [1/1] (short) (narrow) %v3100_v53, 8 }
 0x40f   : > { %v3102_v5 = vpop.eup %3101 }
 0x433   : > { %3098 = vset.pattern.permute.xlu0 %v3163_v22 }
 0x466   : > { %v2219_v6 = vpop.xlane.xlu0 %2218 }
 0x467   : > { %v2220_v7 = vadd.f32 %v3102_v5, %v2219_v6 }
 0x469   : > { %2233 = vperm.xlu1 %3097, %v2220_v7   ;;  %v2221_v8 = vsub.f32 %v2220_v7, %v2219_v6 }
 0x46b   : > { %3103 = vrcp.f32 %v2221_v8 }
 0x478   : > { %v3104_v21 = vpop.eup %3103 }
 0x486   : > { %v2402_v9 = vpop.trf.xlu0 }
 0x487   : > { %v2421_v13 = vrot.slane %v2402_v9, %v3505_v39 }
 0x489   : > { %v2422_v14 = vmul.f32 %v2421_v13, %v2370_v12 }
 0x48b   : > { %v2433_v15 = vrot.slane %v2422_v14, %v3501_v37  ;;  %v2475_v23 = vrot.slane %v2422_v14, %v3541_v20  ;;  %v2426_v25 = vrot.slane %v2422_v14, %v3505_v39  ;;  %v2440_v30 = vrot.slane %v2422_v14, %v3546_v29 }
 0x48c   : > { %v2447_v32 = vrot.slane %v2422_v14, %v3550_v31  ;;  %v2454_v33 = vrot.slane %v2422_v14, %v3554_v27  ;;  %v2461_v36 = vrot.slane %v2422_v14, %v3558_v34  ;;  %v2468_v40 = vrot.slane %v2422_v14, %v3562_v38 }
 0x48d   : > { %2435 = vbcast.lane.b32.xlu0 %v2433_v15, 256 }
 0x491   : > { %2225 = vperm.xlu0 %3098, %v3104_v21  }
 0x492   : > { %2527 = vxpose.xlu1.b32.start.end [1/1] (short) (narrow) %v2221_v8, 8 }
 0x495   : > { %2477 = vbcast.lane.b32.xlu0 %v2475_v23, 256 }
 0x4b0   : > { %2428 = vbcast.lane.b32.xlu1 %v2426_v25, 256 }
 0x4b4   : > { %2442 = vbcast.lane.b32.xlu1 %v2440_v30, 256 }
 0x4b8   : > { %2449 = vbcast.lane.b32.xlu1 %v2447_v32, 256 }
 0x4bc   : > { %2456 = vbcast.lane.b32.xlu1 %v2454_v33, 256  ;;  %v2330_v33 = vld [vmem:[#allocation2 + $0x4] sm:$0x3] }
 0x4c0   : > { %2463 = vbcast.lane.b32.xlu1 %v2461_v36, 256 }
 0x4c4   : > { %2470 = vbcast.lane.b32.xlu1 %v2468_v40, 256 }
 0x4e4   : > { %v2234_v41 = vpop.permute.xlu1 %2233 }
 0x4e5   : > { %v2236_v42 = vmul.f32 %v3367_v26, %v2234_v41 }
 0x4e7   : > { %v3567_v43 = vadd.f32 %v2236_v42, %v3453_v1 }
 0x4e9   : > { %2240 = vxpose.xlu0.b32.start.end [1/1] (short) (narrow) %v3567_v43, 8 }
 0x4ff   : > { %v3570_v44 = vpop.permute.xlu0 %2435 }
 0x50c   : > { %v2226_v45 = vpop.permute.xlu0 %2225 }
 0x50d   : > { %v2228_v46 = vmul.f32 %v2226_v45, %v2215_v58  ;;  %v2238_v48 = vmul.f32 %v3367_v26, %v2226_v45  ;;  %v2331_v45 = vld [vmem:[#allocation2 + $0x6] sm:$0x3] }
 0x50e   : > { %v2543_v57 = vpop.trf.xlu1 }
 0x50f   : > { %v2229_v47 = vsub.f32 0.0, %v2228_v46  ;;  %v2562_v58 = vrot.slane %v2543_v57, %v3505_v39 }
 0x510   : > { %v3581_v1 = vpop.permute.xlu0 %2477 }
 0x511   : > { %v3573_v35 = vmul.f32 %v2229_v47, %v3377_v28 }
 0x513   : > { %2495 = vxpose.xlu0.b32.start.end [1/1] (short) (narrow) %v3573_v35, 8  ;;  %v3578_v49 = vadd.f32 %v2238_v48, %v3573_v35  ;;  %v2332_v48 = vld [vmem:[#allocation2 + $0x8] sm:$0x3] }
 0x517   : > { %2636 = vxpose.xlu0.b32.start.end [1/1] (short) (narrow) %v3578_v49, 8 }
 0x565   : > { %v2256_v50 = vpop.trf.xlu0 }
 0x566   : > { %v2275_v51 = vrot.slane %v2256_v50, %v3505_v39  ;;  %v2289_v52 = vrot.slane %v2256_v50, %v3546_v29  ;;  %v2282_v28 = vrot.slane %v2256_v50, %v3501_v37  ;;  %v2296_v26 = vrot.slane %v2256_v50, %v3550_v31 }
 0x567   : > { %v2303_v53 = vrot.slane %v2256_v50, %v3554_v27  ;;  %v2310_v54 = vrot.slane %v2256_v50, %v3558_v34  ;;  %v2317_v55 = vrot.slane %v2256_v50, %v3562_v38  ;;  %v2324_v56 = vrot.slane %v2256_v50, %v3541_v20 }
 0x568   : > { %2277 = vbcast.lane.b32.xlu1 %v2275_v51, 256  ;;  %2291 = vbcast.lane.b32.xlu0 %v2289_v52, 256  ;;  %v2333_v52 = vld [vmem:[#allocation2 + $0xa] sm:$0x3] }
 0x56c   : > { %2284 = vbcast.lane.b32.xlu1 %v2282_v28, 256 }
 0x570   : > { %2298 = vbcast.lane.b32.xlu1 %v2296_v26, 256 }
 0x574   : > { %2305 = vbcast.lane.b32.xlu1 %v2303_v53, 256  ;;  %v2334_v53 = vld [vmem:[#allocation2 + $0xc] sm:$0x3] }
 0x578   : > { %2312 = vbcast.lane.b32.xlu1 %v2310_v54, 256 }
 0x57c   : > { %2319 = vbcast.lane.b32.xlu1 %v2317_v55, 256 }
 0x580   : > { %2326 = vbcast.lane.b32.xlu1 %v2324_v56, 256  ;;  %v2335_v56 = vld [vmem:[#allocation2 + $0xe] sm:$0x3] }
 0x58f   : > { %v2511_v59 = vpop.trf.xlu0 }
 0x590   : > { %v2563_v19 = vmul.f32 %v2562_v58, %v2511_v59 }
 0x592   : > { %v2567_v22 = vrot.slane %v2563_v19, %v3505_v39  ;;  %v2574_v60 = vrot.slane %v2563_v19, %v3501_v37  ;;  %v2595_v61 = vrot.slane %v2563_v19, %v3554_v27  ;;  %v2581_v62 = vrot.slane %v2563_v19, %v3546_v29 }
 0x593   : > { %v2652_v4 = vpop.trf.xlu0  ;;  %v2609_v5 = vrot.slane %v2563_v19, %v3562_v38  ;;  %v2588_v6 = vrot.slane %v2563_v19, %v3550_v31  ;;  %v2602_v8 = vrot.slane %v2563_v19, %v3558_v34  ;;  %v2616_v12 = vrot.slane %v2563_v19, %v3541_v20 }
 0x594   : > { %2569 = vbcast.lane.b32.xlu0 %v2567_v22, 256  ;;  %2576 = vbcast.lane.b32.xlu1 %v2574_v60, 256  ;;  %v2671_v7 = vrot.slane %v2652_v4, %v3505_v39  ;;  %v2685_v9 = vrot.slane %v2652_v4, %v3546_v29  ;;  %v2699_v13 = vrot.slane %v2652_v4, %v3554_v27 }
 0x595   : > { %v2678_v14 = vrot.slane %v2652_v4, %v3501_v37  ;;  %v2713_v39 = vrot.slane %v2652_v4, %v3562_v38  ;;  %v2692_v15 = vrot.slane %v2652_v4, %v3550_v31  ;;  %v2706_v21 = vrot.slane %v2652_v4, %v3558_v34  ;;  %v2429_v37 = vpop.permute.xlu1 %2428  ;;  %v2328_v31 = vld [vmem:[#allocation2] sm:$0x3]  ;;  %v2329_v34 = vld [vmem:[#allocation2 + $0x2] sm:$0x3] }
 0x596   : > { %v2720_v23 = vrot.slane %v2652_v4, %v3541_v20 }
 0x598   : > { %2597 = vbcast.lane.b32.xlu0 %v2595_v61, 256  ;;  %2583 = vbcast.lane.b32.xlu1 %v2581_v62, 256  ;;  %v2479_v61 = vmul.f32 %v2429_v37, %v3514_v18 }
 0x599   : > { %v2443_v25 = vpop.permute.xlu1 %2442 }
 0x59c   : > { %2611 = vbcast.lane.b32.xlu0 %v2609_v5, 256  ;;  %2590 = vbcast.lane.b32.xlu1 %v2588_v6, 256  ;;  %v2487_v6 = vsub.f32 %v3451_v0, %v2479_v61 }
 0x59d   : > { %v2450_v29 = vpop.permute.xlu1 %2449 }
 0x59e   : > { %v2482_v37 = vmul.f32 %v2450_v29, %v3514_v18 }
 0x5a0   : > { %2673 = vbcast.lane.b32.xlu0 %v2671_v7, 256  ;;  %2604 = vbcast.lane.b32.xlu1 %v2602_v8, 256  ;;  %v2481_v7 = vmul.f32 %v2443_v25, %v3514_v18  ;;  %v2490_v29 = vsub.f32 %v3457_v3, %v2482_v37 }
 0x5a1   : > { %v2457_v30 = vpop.permute.xlu1 %2456 }
 0x5a4   : > { %2687 = vbcast.lane.b32.xlu0 %v2685_v9, 256  ;;  %2618 = vbcast.lane.b32.xlu1 %v2616_v12, 256 }
 0x5a5   : > { %v3614_v32 = vpop.permute.xlu1 %2463 }
 0x5a8   : > { %2701 = vbcast.lane.b32.xlu0 %v2699_v13, 256  ;;  %2680 = vbcast.lane.b32.xlu1 %v2678_v14, 256  ;;  %v2489_v14 = vsub.f32 %v3455_v2, %v2481_v7 }
 0x5a9   : > { %v2471_v27 = vpop.permute.xlu1 %2470 }
 0x5ac   : > { %2715 = vbcast.lane.b32.xlu0 %v2713_v39, 256  ;;  %2694 = vbcast.lane.b32.xlu1 %v2692_v15, 256  ;;  %v2483_v39 = vmul.f32 %v2457_v30, %v3514_v18  ;;  %v2485_v30 = vmul.f32 %v2471_v27, %v3514_v18 }
 0x5ae   : > { %v2491_v2 = vsub.f32 %v3469_v10, %v2483_v39  ;;  %v2493_v10 = vsub.f32 %v3479_v16, %v2485_v30 }
 0x5b0   : > { %2708 = vbcast.lane.b32.xlu1 %v2706_v21, 256 }
 0x5b4   : > { %2722 = vbcast.lane.b32.xlu1 %v2720_v23, 256 }
 0x5da   : > { %v2278_v36 = vpop.permute.xlu1 %2277  ;;  %v2292_v40 = vpop.permute.xlu0 %2291 }
 0x5db   : > { %v2337_v38 = vsel %vm3360_vm2, %v2278_v36, %v2328_v31  ;;  %v2339_v20 = vsel %vm3360_vm2, %v2292_v40, %v2330_v33 }
 0x5dc   : > { %2345 = vst.msk [vmem:[#allocation2] sm:$0x3] %vm609_vm4, %v2337_v38  ;;  %2347 = vst.msk [vmem:[#allocation2 + $0x4] sm:$0x3] %vm609_vm4, %v2339_v20 }
 0x5de   : > { %v2285_v41 = vpop.permute.xlu1 %2284 }
 0x5df   : > { %v2338_v42 = vsel %vm3360_vm2, %v2285_v41, %v2329_v34 }
 0x5e0   : > { %2346 = vst.msk [vmem:[#allocation2 + $0x2] sm:$0x3] %vm609_vm4, %v2338_v42 }
 0x5e2   : > { %v2299_v46 = vpop.permute.xlu1 %2298 }
 0x5e3   : > { %v2340_v47 = vsel %vm3360_vm2, %v2299_v46, %v2331_v45 }
 0x5e4   : > { %2348 = vst.msk [vmem:[#allocation2 + $0x6] sm:$0x3] %vm609_vm4, %v2340_v47 }
 0x5e6   : > { %v2306_v50 = vpop.permute.xlu1 %2305 }
 0x5e7   : > { %v2341_v51 = vsel %vm3360_vm2, %v2306_v50, %v2332_v48 }
 0x5e8   : > { %2349 = vst.msk [vmem:[#allocation2 + $0x8] sm:$0x3] %vm609_vm4, %v2341_v51 }
 0x5ea   : > { %v2313_v28 = vpop.permute.xlu1 %2312 }
 0x5eb   : > { %v2342_v26 = vsel %vm3360_vm2, %v2313_v28, %v2333_v52 }
 0x5ec   : > { %2350 = vst.msk [vmem:[#allocation2 + $0xa] sm:$0x3] %vm609_vm4, %v2342_v26 }
 0x5ee   : > { %v2320_v54 = vpop.permute.xlu1 %2319 }
 0x5ef   : > { %v2343_v55 = vsel %vm3360_vm2, %v2320_v54, %v2334_v53 }
 0x5f0   : > { %2351 = vst.msk [vmem:[#allocation2 + $0xc] sm:$0x3] %vm609_vm4, %v2343_v55 }
 0x5f2   : > { %v2327_v57 = vpop.permute.xlu1 %2326 }
 0x5f3   : > { %v2344_v58 = vsel %vm3360_vm2, %v2327_v57, %v2335_v56 }
 0x5f4   : > { %2352 = vst.msk [vmem:[#allocation2 + $0xe] sm:$0x3] %vm609_vm4, %v2344_v58 }
 0x5f5   : > { %2353 = vst.msk [vmem:[%s3371_s12] sm:$0x3] %vm609_vm4, %v3567_v43  ;;  %v2480_v43 = vmul.f32 %v3570_v44, %v3514_v18 }
 0x5f7   : > { %v2488_v44 = vsub.f32 %v3449_v63, %v2480_v43  ;;  %v2484_v63 = vmul.f32 %v3614_v32, %v3514_v18  ;;  %v2486_v32 = vmul.f32 %v3581_v1, %v3514_v18 }
 0x5f9   : > { %v2492_v16 = vsub.f32 %v3471_v11, %v2484_v63  ;;  %v2494_v53 = vsub.f32 %v3481_v17, %v2486_v32 }
 0x606   : > { %v2570_v59 = vpop.permute.xlu0 %2569  ;;  %v2577_v19 = vpop.permute.xlu1 %2576 }
 0x607   : > { %v2620_v62 = vmul.f32 %v2570_v59, %v3573_v35  ;;  %v2621_v0 = vmul.f32 %v2577_v19, %v3573_v35 }
 0x609   : > { %v2628_v8 = vadd.f32 %v2620_v62, %v2487_v6  ;;  %v2629_v36 = vadd.f32 %v2621_v0, %v2488_v44 }
 0x60a   : > { %v2598_v22 = vpop.permute.xlu0 %2597  ;;  %v2584_v60 = vpop.permute.xlu1 %2583 }
 0x60b   : > { %v2622_v9 = vmul.f32 %v2584_v60, %v3573_v35  ;;  %v2624_v21 = vmul.f32 %v2598_v22, %v3573_v35 }
 0x60d   : > { %v2630_v23 = vadd.f32 %v2622_v9, %v2489_v14  ;;  %v2632_v38 = vadd.f32 %v2624_v21, %v2491_v2 }
 0x60e   : > { %v2612_v4 = vpop.permute.xlu0 %2611  ;;  %v2591_v5 = vpop.permute.xlu1 %2590 }
 0x60f   : > { %v2626_v40 = vmul.f32 %v2612_v4, %v3573_v35  ;;  %v2623_v34 = vmul.f32 %v2591_v5, %v3573_v35 }
 0x611   : > { %v2634_v45 = vadd.f32 %v2626_v40, %v2493_v10  ;;  %v2631_v46 = vadd.f32 %v2623_v34, %v2490_v29 }
 0x612   : > { %v2674_v12 = vpop.permute.xlu0 %2673  ;;  %v2605_v13 = vpop.permute.xlu1 %2604 }
 0x613   : > { %v2724_v15 = vsel %vm3360_vm2, %v2674_v12, %v2628_v8  ;;  %v2625_v3 = vmul.f32 %v2605_v13, %v3573_v35 }
 0x614   : > { %2732 = vst.msk [vmem:[#allocation3] sm:$0x3] %vm609_vm4, %v2724_v15 }
 0x615   : > { %v2633_v52 = vadd.f32 %v2625_v3, %v2492_v16 }
 0x616   : > { %v2688_v25 = vpop.permute.xlu0 %2687  ;;  %v2619_v31 = vpop.permute.xlu1 %2618 }
 0x617   : > { %v2726_v33 = vsel %vm3360_vm2, %v2688_v25, %v2630_v23  ;;  %v2627_v28 = vmul.f32 %v2619_v31, %v3573_v35 }
 0x618   : > { %2734 = vst.msk [vmem:[#allocation3 + $0x4] sm:$0x3] %vm609_vm4, %v2726_v33 }
 0x619   : > { %v2635_v11 = vadd.f32 %v2627_v28, %v2494_v53 }
 0x61a   : > { %v2702_v20 = vpop.permute.xlu0 %2701  ;;  %v2681_v41 = vpop.permute.xlu1 %2680 }
 0x61b   : > { %v2728_v27 = vsel %vm3360_vm2, %v2702_v20, %v2632_v38  ;;  %v2725_v42 = vsel %vm3360_vm2, %v2681_v41, %v2629_v36 }
 0x61c   : > { %2736 = vst.msk [vmem:[#allocation3 + $0x8] sm:$0x3] %vm609_vm4, %v2728_v27  ;;  %2733 = vst.msk [vmem:[#allocation3 + $0x2] sm:$0x3] %vm609_vm4, %v2725_v42 }
 0x61e   : > { %v2716_v47 = vpop.permute.xlu0 %2715  ;;  %v2695_v48 = vpop.permute.xlu1 %2694 }
 0x61f   : > { %v2730_v50 = vsel %vm3360_vm2, %v2716_v47, %v2634_v45  ;;  %v2727_v51 = vsel %vm3360_vm2, %v2695_v48, %v2631_v46 }
 0x620   : > { %2738 = vst.msk [vmem:[#allocation3 + $0xc] sm:$0x3] %vm609_vm4, %v2730_v50  ;;  %2735 = vst.msk [vmem:[#allocation3 + $0x6] sm:$0x3] %vm609_vm4, %v2727_v51 }
 0x622   : > { %v2709_v26 = vpop.permute.xlu1 %2708 }
 0x623   : > { %v2729_v18 = vsel %vm3360_vm2, %v2709_v26, %v2633_v52 }
 0x624   : > { %2737 = vst.msk [vmem:[#allocation3 + $0xa] sm:$0x3] %vm609_vm4, %v2729_v18 }
 0x625   : > { %2746 = sbr.rel (%p3608_p13) target bundleno = 1584 (0x630), region = 84 }
 0x626   : > { %v2723_v1 = vpop.permute.xlu1 %2722 }
 0x627   : > { %v2731_v54 = vsel %vm3360_vm2, %v2723_v1, %v2635_v11 }
 0x628   : > { %2739 = vst.msk [vmem:[#allocation3 + $0xe] sm:$0x3] %vm609_vm4, %v2731_v54 }
 0x629   : > { %2740 = vst.msk [vmem:[%s3510_s17] sm:$0x3] %vm609_vm4, %v3578_v49 }
 0x62a   : > { %v2747_v35 = vld [vmem:[#allocation2] sm:$0x3]  ;;  %v2748_v17 = vld [vmem:[#allocation2 + $0x2] sm:$0x3]  ;;  %v2749_v24 = vld [vmem:[#allocation2 + $0x4] sm:$0x3] }
 0x62b   : > { %2755 = vst.msk [vmem:[%s3320_s29] sm:$0x3] %vm609_vm4, %v2747_v35  ;;  %2756 = vst.msk [vmem:[%s3320_s29 + $0x2] sm:$0x3] %vm609_vm4, %v2748_v17  ;;  %v2750_v49 = vld [vmem:[#allocation2 + $0x6] sm:$0x3] }
 0x62c   : > { %2757 = vst.msk [vmem:[%s3320_s29 + $0x4] sm:$0x3] %vm609_vm4, %v2749_v24  ;;  %v2751_v55 = vld [vmem:[#allocation2 + $0x8] sm:$0x3]  ;;  %v2752_v56 = vld [vmem:[#allocation2 + $0xa] sm:$0x3] }
 0x62d   : > { %2758 = vst.msk [vmem:[%s3320_s29 + $0x6] sm:$0x3] %vm609_vm4, %v2750_v49  ;;  %2759 = vst.msk [vmem:[%s3320_s29 + $0x8] sm:$0x3] %vm609_vm4, %v2751_v55  ;;  %v2753_v57 = vld [vmem:[#allocation2 + $0xc] sm:$0x3] }
 0x62e   : > { %2760 = vst.msk [vmem:[%s3320_s29 + $0xa] sm:$0x3] %vm609_vm4, %v2752_v56  ;;  %v2754_v58 = vld [vmem:[#allocation2 + $0xe] sm:$0x3]  ;;  %2761 = vst.msk [vmem:[%s3320_s29 + $0xc] sm:$0x3] %vm609_vm4, %v2753_v57 }
 0x62f   : > { %2762 = vst.msk [vmem:[%s3320_s29 + $0xe] sm:$0x3] %vm609_vm4, %v2754_v58 }
 0x630 PF: > { %s3772_s15 = sld [smem:[#allocation9_spill]] }
 0x631   : > { %s3774_s16 = sld [smem:[#allocation7_spill]] }
 0x632   : > { %s3775_s17 = sld [smem:[#allocation8_spill]] }
 0x633   : > { %s3776_s18 = sld [smem:[#allocation10_spill]] }
 0x634   : > { %s3777_s19 = sld [smem:[#allocation11_spill]] }
 0x635   : > { %s3778_s20 = sld [smem:[#allocation12_spill]] }
 0x636   : > { %s26_s21 = sadd.s32 1, %s3772_s15   ;;  %s3773_s15 = sld [smem:[#allocation6_spill]] }
 0x637   : > { %p23_p0 = scmp.ge.s32.totalorder %s26_s21, 34  }
 0x639   :  { %25 = sbr.rel (!%p23_p0) target bundleno = 5 (0x5), region = 128 }

</bundles_post_ra>
